<compile_context>
chip_gen: v7x
topology: tpu7x:2x2x1
jax: 0.10.0
libtpu: 0.0.40
codegen_flags: <defaults>
</compile_context>

<pallas_src>
import functools
import math

import jax
import jax.numpy as jnp
import numpy as np
from jax import lax
from jax.experimental import pallas as pl
from jax.experimental.pallas import tpu as pltpu

EPS = 1e-5                          # nn.BatchNorm2d default eps
LANES = 128                         # lane width -> output-channel padding
VMEM_BUDGET = 24 * 1024 * 1024      # per-step working-set target (safe on v5e/v6e/v7x)
VMEM_LIMIT = 48 * 1024 * 1024       # explicit scoped-VMEM limit (below v7x's 64 MiB)


def _round_up(x, m):
    return ((x + m - 1) // m) * m


def _pick_row_tile(ho, wo, kh, wp, cin, kkc, cout_p):
    """Pick the output-row tile th: th | ho, th % 8 == 0, (th*wo) % 128 == 0 (so the
    kernel-2 channel-major stores stay lane-dense), sized so the double-buffered per-step
    working set stays within VMEM_BUDGET.  Falls back to the whole image for small or
    awkward spatial sizes (where it trivially fits)."""
    def est(th):
        x_b   = 2 * (th + kh - 1) * wp * cin * 2        # bf16 halo input tile, 2-buffered
        w_b   = 2 * kkc * cout_p * 2                    # bf16 weights, 2-buffered
        c_b   = 2 * th * wo * cout_p * 2                # bf16 conv out tile, 2-buffered
        acc_b = th * wo * cout_p * 4                    # live f32 tap accumulator
        o_b   = 2 * cout_p * th * wo * 4                # f32 kernel-2 out tile, 2-buffered
        return x_b + w_b + c_b + acc_b + o_b
    cands = [d for d in range(8, ho, 8) if ho % d == 0 and (d * wo) % 128 == 0]
    fitting = [d for d in cands if est(d) <= VMEM_BUDGET]
    if fitting:
        return max(fitting)
    if cands:
        return min(cands)
    return ho


def conv_stats_kernel(x_ref, w_ref, conv_ref, stats_ref, *, kh, kw, th, wo, cin):
    # x_ref:     (th + kh - 1, wp, cin)   bf16   overlapping (halo) input row tile
    # w_ref:     (kh*kw, cin, cout_p)     bf16   per-tap weight slabs (aligned slices)
    # conv_ref:  (th*wo, cout_p)          bf16   conv output tile (lane-dense)
    # stats_ref: (2, cout_p)              f32    per-tile [sum ; sum-of-squares]
    cout_p = w_ref.shape[-1]
    acc = jnp.zeros((th * wo, cout_p), jnp.float32)
    # Tap accumulation: kh*kw small MXU matmuls with f32 accumulation.  No im2col patch
    # scratch and no lane-masked partial stores -- each tap reads a shifted slice straight
    # from the pipelined VMEM block.
    for i in range(kh):
        for j in range(kw):
            patch = x_ref[i:i + th, j:j + wo, :].reshape(th * wo, cin)
            acc = acc + jnp.dot(patch, w_ref[i * kw + j],
                                preferred_element_type=jnp.float32)
    # BatchNorm partials from the f32 accumulator (before the bf16 downcast).
    stats_ref[...] = jnp.concatenate(
        [jnp.sum(acc, axis=0, keepdims=True),
         jnp.sum(acc * acc, axis=0, keepdims=True)], axis=0)
    conv_ref[...] = acc.astype(conv_ref.dtype)


def bn_relu_kernel(x_ref, scale_ref, bias_ref, o_ref, *, cout, apply_relu):
    # x_ref:  (th*wo, cout_p) bf16 conv tile;  scale/bias: (1, cout_p) f32
    # o_ref:  (cout, th*wo)   f32  -> block of the final channel-major (NCHW) output.
    y = x_ref[...].astype(jnp.float32) * scale_ref[...] + bias_ref[...]
    if apply_relu:
        y = jnp.maximum(y, 0.0)
    # Transpose the full lane-dense tile (native shape for the XLU), then drop the channel
    # padding with a cheap sublane slice; the wrapper only needs a metadata reshape.
    o_ref[...] = y.T[:cout, :]


def conv_bn_relu(x_nchw, weight_oihw, gamma, beta, *, stride=1, padding=None,
                 activation=True, slab_dtype=jnp.bfloat16):
    """Conv2d(bias=False, groups=1, stride=1) + BatchNorm2d (training stats) + ReLU."""
    n, cin, h, w = x_nchw.shape
    cout, cin_w, kh, kw = weight_oihw.shape
    assert cin_w == cin, "groups != 1 not implemented"
    assert stride == 1, "stride != 1 not implemented"
    # TODO(synk): stride>1 / groups>1 paths of nn.Conv2d are not implemented.
    # TODO(synk): BatchNorm2d running_mean/running_var (momentum) buffer updates are not
    #             produced; only the training-mode forward output is.
    # TODO(synk): for very small Cin a space-to-depth input packing would further raise
    #             MXU contraction-dim fill; not done here to keep conv semantics simple.
    pad = kh // 2 if padding is None else padding
    ho = h + 2 * pad - kh + 1
    wo = w + 2 * pad - kw + 1
    hp, wp = h + 2 * pad, w + 2 * pad
    m = n * ho * wo
    cout_p = _round_up(cout, LANES)
    kkc = kh * kw * cin

    th = _pick_row_tile(ho, wo, kh, wp, cin, kkc, cout_p)
    nrt = ho // th
    rows = th * wo

    # ---- glue pass: NHWC + bf16 cast + zero pad + overlapped row tiles ----------------
    # A single fused XLA pass over the input builds (n, nrt, th+kh-1, wp, cin); the
    # (kh-1)-row halo per tile is duplicated in HBM so each grid step's input window is a
    # plain Blocked block -> full auto double-buffering with no manual DMA.
    x = jnp.transpose(x_nchw, (0, 2, 3, 1)).astype(jnp.bfloat16)
    x = jnp.pad(x, ((0, 0), (pad, pad), (pad, pad), (0, 0)))
    if nrt == 1:
        xt = x[:, None]                                   # (n, 1, hp, wp, cin); hp == th+kh-1
    else:
        xt = jnp.stack([x[:, r * th: r * th + th + kh - 1] for r in range(nrt)], axis=1)

    # Per-tap weight slabs (kh*kw, cin, cout_p): aligned sublane slices inside the kernel.
    w_taps = jnp.transpose(weight_oihw, (2, 3, 1, 0)).reshape(kh * kw, cin, cout)
    w_taps = jnp.pad(w_taps, ((0, 0), (0, 0), (0, cout_p - cout))).astype(jnp.bfloat16)

    # ---- kernel 1: tap-accumulated conv + per-tile BN partial statistics --------------
    conv_flops = 2 * m * kkc * cout_p
    bytes_acc = (xt.size * 2 + w_taps.size * 2
                 + n * nrt * rows * cout_p * 2 + n * nrt * 2 * cout_p * 4)
    conv_out, stats = pl.pallas_call(
        functools.partial(conv_stats_kernel, kh=kh, kw=kw, th=th, wo=wo, cin=cin),
        grid=(n, nrt),
        in_specs=[
            pl.BlockSpec((None, None, th + kh - 1, wp, cin),
                         lambda b, r: (b, r, 0, 0, 0)),
            # Constant index map: weights are DMA'd once (still double-buffered in VMEM;
            # 2*kkc*cout_p*2 B, acceptable for typical conv shapes).
            pl.BlockSpec((kh * kw, cin, cout_p), lambda b, r: (0, 0, 0)),
        ],
        out_specs=(
            pl.BlockSpec((None, None, rows, cout_p), lambda b, r: (b, r, 0, 0)),
            pl.BlockSpec((None, None, 2, cout_p), lambda b, r: (b, r, 0, 0)),
        ),
        out_shape=(
            jax.ShapeDtypeStruct((n, nrt, rows, cout_p), slab_dtype),
            jax.ShapeDtypeStruct((n, nrt, 2, cout_p), jnp.float32),
        ),
        compiler_params=pltpu.CompilerParams(
            dimension_semantics=("parallel", "parallel"),
            vmem_limit_bytes=VMEM_LIMIT),
        cost_estimate=pl.CostEstimate(flops=conv_flops, transcendentals=0,
                                      bytes_accessed=bytes_acc),
    )(xt, w_taps)

    # ---- glue: combine per-tile stats (Chan parallel variance) -> scale/bias ----------
    cnt = float(rows)                                   # every tile is full (th | ho)
    sum_t = stats[:, :, 0, :]
    sq_t = stats[:, :, 1, :]
    mean_t = sum_t / cnt
    m2_t = jnp.maximum(sq_t - sum_t * mean_t, 0.0)      # per-tile sum of squared deviations
    mean = jnp.sum(sum_t, axis=(0, 1)) / m
    m2 = jnp.sum(m2_t, axis=(0, 1)) + jnp.sum(cnt * (mean_t - mean) ** 2, axis=(0, 1))
    var = jnp.maximum(m2 / m, 0.0)                      # biased batch variance

    gamma_p = jnp.pad(gamma.astype(jnp.float32), (0, cout_p - cout))
    beta_p = jnp.pad(beta.astype(jnp.float32), (0, cout_p - cout))
    scale = (gamma_p * lax.rsqrt(var + EPS)).reshape(1, cout_p)
    bias = (beta_p - mean * scale[0]).reshape(1, cout_p)

    # ---- kernel 2: fused epilogue y = relu(x*scale + bias) -> NCHW-flattened output ---
    out = pl.pallas_call(
        functools.partial(bn_relu_kernel, cout=cout, apply_relu=activation),
        grid=(n, nrt),
        in_specs=[
            pl.BlockSpec((None, None, rows, cout_p), lambda b, r: (b, r, 0, 0)),
            pl.BlockSpec((1, cout_p), lambda b, r: (0, 0)),
            pl.BlockSpec((1, cout_p), lambda b, r: (0, 0)),
        ],
        out_specs=pl.BlockSpec((None, cout, rows), lambda b, r: (b, 0, r)),
        out_shape=jax.ShapeDtypeStruct((n, cout, ho * wo), jnp.float32),
        compiler_params=pltpu.CompilerParams(
            dimension_semantics=("parallel", "parallel"),
            vmem_limit_bytes=VMEM_LIMIT),
    )(conv_out, scale, bias)

    return out.reshape(n, cout, ho, wo)                 # metadata-only reshape (NCHW)


if __name__ == "__main__":
    key = jax.random.PRNGKey(0)
    k1, k2, k3, k4 = jax.random.split(key, 4)

    N, Cin, H, W = 2, 4, 16, 16
    Cout, K = 8, 3          # Conv(in=4, out=8, kernel_size=3) -> padding = 1

    x = jax.random.normal(k1, (N, Cin, H, W), jnp.float32)
    bound = 1.0 / math.sqrt(Cin * K * K)
    weight = jax.random.uniform(k2, (Cout, Cin, K, K), jnp.float32, -bound, bound)
    gamma = jax.random.uniform(k3, (Cout,), jnp.float32, 0.5, 1.5)
    beta = 0.1 * jax.random.normal(k4, (Cout,), jnp.float32)

    y = conv_bn_relu(x, weight, gamma, beta)
    y = jax.block_until_ready(y)

    # Pure-JAX reference.  The reference uses the same bf16 quantization of the matmul
    # operands as the kernel (f32 accumulation in both); the kernel additionally stores
    # the conv intermediate in bf16 (stats reduced pre-cast), so tolerances are set to
    # cover that ~2^-9 relative rounding of the normalized values.
    xq = x.astype(jnp.bfloat16).astype(jnp.float32)
    wq = weight.astype(jnp.bfloat16).astype(jnp.float32)
    conv = lax.conv_general_dilated(
        xq, wq, window_strides=(1, 1), padding=[(1, 1), (1, 1)],
        dimension_numbers=("NCHW", "OIHW", "NCHW"))
    mean = conv.mean(axis=(0, 2, 3), keepdims=True)
    var = ((conv - mean) ** 2).mean(axis=(0, 2, 3), keepdims=True)
    ref = (conv - mean) * lax.rsqrt(var + EPS)
    ref = ref * gamma[None, :, None, None] + beta[None, :, None, None]
    ref = jnp.maximum(ref, 0.0)

    np.testing.assert_allclose(np.asarray(y), np.asarray(ref), atol=2e-2, rtol=2e-2)
    print("KERNEL_OK")
</pallas_src>

<mosaic_0001>
module attributes {stable_mosaic.version = 11 : i64} {
  func.func @conv_stats_kernel(%arg0: i32, %arg1: i32, %arg2: memref<1x1x10x18x4xbf16, #tpu.memory_space<vmem>>, %arg3: memref<9x4x128xbf16, #tpu.memory_space<vmem>>, %arg4: memref<1x1x128x128xbf16, #tpu.memory_space<vmem>>, %arg5: memref<1x1x2x128xf32, #tpu.memory_space<vmem>>) attributes {dimension_semantics = [#tpu.dimension_semantics<parallel>, #tpu.dimension_semantics<parallel>], iteration_bounds = array<i64: 2, 2>, scalar_prefetch = 0 : i64, scratch_operands = 0 : i64, tpu.core_type = #tpu.core_type<tc>, window_params = [{transform_indices = @transform_0, window_bounds = array<i64: 1, 1, 10, 18, 4>}, {pipeline_mode = #tpu.pipeline_mode<synchronous>, transform_indices = @transform_1, window_bounds = array<i64: 9, 4, 128>}, {transform_indices = @transform_2, window_bounds = array<i64: 1, 1, 128, 128>}, {transform_indices = @transform_3, window_bounds = array<i64: 1, 1, 2, 128>}]} {
    %cst = arith.constant 0.000000e+00 : f32
    %0 = vector.broadcast %cst : f32 to vector<128x128xf32>
    %c0 = arith.constant 0 : index
    %c0_0 = arith.constant 0 : index
    %c0_1 = arith.constant 0 : index
    %c0_2 = arith.constant 0 : index
    %c0_3 = arith.constant 0 : index
    %1 = vector.load %arg2[%c0, %c0_0, %c0_1, %c0_2, %c0_3] : memref<1x1x10x18x4xbf16, #tpu.memory_space<vmem>>, vector<1x1x8x16x4xbf16>
    %2 = vector.shape_cast %1 : vector<1x1x8x16x4xbf16> to vector<8x16x4xbf16>
    %3 = vector.shape_cast %2 : vector<8x16x4xbf16> to vector<128x4xbf16>
    %c0_4 = arith.constant 0 : index
    %c0_5 = arith.constant 0 : index
    %c0_6 = arith.constant 0 : index
    %4 = vector.load %arg3[%c0_4, %c0_5, %c0_6] : memref<9x4x128xbf16, #tpu.memory_space<vmem>>, vector<1x4x128xbf16>
    %5 = vector.shape_cast %4 : vector<1x4x128xbf16> to vector<4x128xbf16>
    %cst_7 = arith.constant dense<0.000000e+00> : vector<128x128xf32>
    %6 = tpu.matmul %3, %5, %cst_7 {dimension_numbers = #tpu.dot_dimension_numbers<[1], [0], [0], [1], [0, 0, 1, 1], [], []>} : vector<128x4xbf16>, vector<4x128xbf16>, vector<128x128xf32> -> vector<128x128xf32>
    %7 = arith.addf %0, %6 : vector<128x128xf32>
    %c0_8 = arith.constant 0 : index
    %c0_9 = arith.constant 0 : index
    %c0_10 = arith.constant 0 : index
    %c1 = arith.constant 1 : index
    %c0_11 = arith.constant 0 : index
    %8 = vector.load %arg2[%c0_8, %c0_9, %c0_10, %c1, %c0_11] : memref<1x1x10x18x4xbf16, #tpu.memory_space<vmem>>, vector<1x1x8x16x4xbf16>
    %9 = vector.shape_cast %8 : vector<1x1x8x16x4xbf16> to vector<8x16x4xbf16>
    %10 = vector.shape_cast %9 : vector<8x16x4xbf16> to vector<128x4xbf16>
    %c1_12 = arith.constant 1 : index
    %c0_13 = arith.constant 0 : index
    %c0_14 = arith.constant 0 : index
    %11 = vector.load %arg3[%c1_12, %c0_13, %c0_14] : memref<9x4x128xbf16, #tpu.memory_space<vmem>>, vector<1x4x128xbf16>
    %12 = vector.shape_cast %11 : vector<1x4x128xbf16> to vector<4x128xbf16>
    %cst_15 = arith.constant dense<0.000000e+00> : vector<128x128xf32>
    %13 = tpu.matmul %10, %12, %cst_15 {dimension_numbers = #tpu.dot_dimension_numbers<[1], [0], [0], [1], [0, 0, 1, 1], [], []>} : vector<128x4xbf16>, vector<4x128xbf16>, vector<128x128xf32> -> vector<128x128xf32>
    %14 = arith.addf %7, %13 : vector<128x128xf32>
    %c0_16 = arith.constant 0 : index
    %c0_17 = arith.constant 0 : index
    %c0_18 = arith.constant 0 : index
    %c2 = arith.constant 2 : index
    %c0_19 = arith.constant 0 : index
    %15 = vector.load %arg2[%c0_16, %c0_17, %c0_18, %c2, %c0_19] : memref<1x1x10x18x4xbf16, #tpu.memory_space<vmem>>, vector<1x1x8x16x4xbf16>
    %16 = vector.shape_cast %15 : vector<1x1x8x16x4xbf16> to vector<8x16x4xbf16>
    %17 = vector.shape_cast %16 : vector<8x16x4xbf16> to vector<128x4xbf16>
    %c2_20 = arith.constant 2 : index
    %c0_21 = arith.constant 0 : index
    %c0_22 = arith.constant 0 : index
    %18 = vector.load %arg3[%c2_20, %c0_21, %c0_22] : memref<9x4x128xbf16, #tpu.memory_space<vmem>>, vector<1x4x128xbf16>
    %19 = vector.shape_cast %18 : vector<1x4x128xbf16> to vector<4x128xbf16>
    %cst_23 = arith.constant dense<0.000000e+00> : vector<128x128xf32>
    %20 = tpu.matmul %17, %19, %cst_23 {dimension_numbers = #tpu.dot_dimension_numbers<[1], [0], [0], [1], [0, 0, 1, 1], [], []>} : vector<128x4xbf16>, vector<4x128xbf16>, vector<128x128xf32> -> vector<128x128xf32>
    %21 = arith.addf %14, %20 : vector<128x128xf32>
    %c0_24 = arith.constant 0 : index
    %c0_25 = arith.constant 0 : index
    %c1_26 = arith.constant 1 : index
    %c0_27 = arith.constant 0 : index
    %c0_28 = arith.constant 0 : index
    %22 = vector.load %arg2[%c0_24, %c0_25, %c1_26, %c0_27, %c0_28] : memref<1x1x10x18x4xbf16, #tpu.memory_space<vmem>>, vector<1x1x8x16x4xbf16>
    %23 = vector.shape_cast %22 : vector<1x1x8x16x4xbf16> to vector<8x16x4xbf16>
    %24 = vector.shape_cast %23 : vector<8x16x4xbf16> to vector<128x4xbf16>
    %c3 = arith.constant 3 : index
    %c0_29 = arith.constant 0 : index
    %c0_30 = arith.constant 0 : index
    %25 = vector.load %arg3[%c3, %c0_29, %c0_30] : memref<9x4x128xbf16, #tpu.memory_space<vmem>>, vector<1x4x128xbf16>
    %26 = vector.shape_cast %25 : vector<1x4x128xbf16> to vector<4x128xbf16>
    %cst_31 = arith.constant dense<0.000000e+00> : vector<128x128xf32>
    %27 = tpu.matmul %24, %26, %cst_31 {dimension_numbers = #tpu.dot_dimension_numbers<[1], [0], [0], [1], [0, 0, 1, 1], [], []>} : vector<128x4xbf16>, vector<4x128xbf16>, vector<128x128xf32> -> vector<128x128xf32>
    %28 = arith.addf %21, %27 : vector<128x128xf32>
    %c0_32 = arith.constant 0 : index
    %c0_33 = arith.constant 0 : index
    %c1_34 = arith.constant 1 : index
    %c1_35 = arith.constant 1 : index
    %c0_36 = arith.constant 0 : index
    %29 = vector.load %arg2[%c0_32, %c0_33, %c1_34, %c1_35, %c0_36] : memref<1x1x10x18x4xbf16, #tpu.memory_space<vmem>>, vector<1x1x8x16x4xbf16>
    %30 = vector.shape_cast %29 : vector<1x1x8x16x4xbf16> to vector<8x16x4xbf16>
    %31 = vector.shape_cast %30 : vector<8x16x4xbf16> to vector<128x4xbf16>
    %c4 = arith.constant 4 : index
    %c0_37 = arith.constant 0 : index
    %c0_38 = arith.constant 0 : index
    %32 = vector.load %arg3[%c4, %c0_37, %c0_38] : memref<9x4x128xbf16, #tpu.memory_space<vmem>>, vector<1x4x128xbf16>
    %33 = vector.shape_cast %32 : vector<1x4x128xbf16> to vector<4x128xbf16>
    %cst_39 = arith.constant dense<0.000000e+00> : vector<128x128xf32>
    %34 = tpu.matmul %31, %33, %cst_39 {dimension_numbers = #tpu.dot_dimension_numbers<[1], [0], [0], [1], [0, 0, 1, 1], [], []>} : vector<128x4xbf16>, vector<4x128xbf16>, vector<128x128xf32> -> vector<128x128xf32>
    %35 = arith.addf %28, %34 : vector<128x128xf32>
    %c0_40 = arith.constant 0 : index
    %c0_41 = arith.constant 0 : index
    %c1_42 = arith.constant 1 : index
    %c2_43 = arith.constant 2 : index
    %c0_44 = arith.constant 0 : index
    %36 = vector.load %arg2[%c0_40, %c0_41, %c1_42, %c2_43, %c0_44] : memref<1x1x10x18x4xbf16, #tpu.memory_space<vmem>>, vector<1x1x8x16x4xbf16>
    %37 = vector.shape_cast %36 : vector<1x1x8x16x4xbf16> to vector<8x16x4xbf16>
    %38 = vector.shape_cast %37 : vector<8x16x4xbf16> to vector<128x4xbf16>
    %c5 = arith.constant 5 : index
    %c0_45 = arith.constant 0 : index
    %c0_46 = arith.constant 0 : index
    %39 = vector.load %arg3[%c5, %c0_45, %c0_46] : memref<9x4x128xbf16, #tpu.memory_space<vmem>>, vector<1x4x128xbf16>
    %40 = vector.shape_cast %39 : vector<1x4x128xbf16> to vector<4x128xbf16>
    %cst_47 = arith.constant dense<0.000000e+00> : vector<128x128xf32>
    %41 = tpu.matmul %38, %40, %cst_47 {dimension_numbers = #tpu.dot_dimension_numbers<[1], [0], [0], [1], [0, 0, 1, 1], [], []>} : vector<128x4xbf16>, vector<4x128xbf16>, vector<128x128xf32> -> vector<128x128xf32>
    %42 = arith.addf %35, %41 : vector<128x128xf32>
    %c0_48 = arith.constant 0 : index
    %c0_49 = arith.constant 0 : index
    %c2_50 = arith.constant 2 : index
    %c0_51 = arith.constant 0 : index
    %c0_52 = arith.constant 0 : index
    %43 = vector.load %arg2[%c0_48, %c0_49, %c2_50, %c0_51, %c0_52] : memref<1x1x10x18x4xbf16, #tpu.memory_space<vmem>>, vector<1x1x8x16x4xbf16>
    %44 = vector.shape_cast %43 : vector<1x1x8x16x4xbf16> to vector<8x16x4xbf16>
    %45 = vector.shape_cast %44 : vector<8x16x4xbf16> to vector<128x4xbf16>
    %c6 = arith.constant 6 : index
    %c0_53 = arith.constant 0 : index
    %c0_54 = arith.constant 0 : index
    %46 = vector.load %arg3[%c6, %c0_53, %c0_54] : memref<9x4x128xbf16, #tpu.memory_space<vmem>>, vector<1x4x128xbf16>
    %47 = vector.shape_cast %46 : vector<1x4x128xbf16> to vector<4x128xbf16>
    %cst_55 = arith.constant dense<0.000000e+00> : vector<128x128xf32>
    %48 = tpu.matmul %45, %47, %cst_55 {dimension_numbers = #tpu.dot_dimension_numbers<[1], [0], [0], [1], [0, 0, 1, 1], [], []>} : vector<128x4xbf16>, vector<4x128xbf16>, vector<128x128xf32> -> vector<128x128xf32>
    %49 = arith.addf %42, %48 : vector<128x128xf32>
    %c0_56 = arith.constant 0 : index
    %c0_57 = arith.constant 0 : index
    %c2_58 = arith.constant 2 : index
    %c1_59 = arith.constant 1 : index
    %c0_60 = arith.constant 0 : index
    %50 = vector.load %arg2[%c0_56, %c0_57, %c2_58, %c1_59, %c0_60] : memref<1x1x10x18x4xbf16, #tpu.memory_space<vmem>>, vector<1x1x8x16x4xbf16>
    %51 = vector.shape_cast %50 : vector<1x1x8x16x4xbf16> to vector<8x16x4xbf16>
    %52 = vector.shape_cast %51 : vector<8x16x4xbf16> to vector<128x4xbf16>
    %c7 = arith.constant 7 : index
    %c0_61 = arith.constant 0 : index
    %c0_62 = arith.constant 0 : index
    %53 = vector.load %arg3[%c7, %c0_61, %c0_62] : memref<9x4x128xbf16, #tpu.memory_space<vmem>>, vector<1x4x128xbf16>
    %54 = vector.shape_cast %53 : vector<1x4x128xbf16> to vector<4x128xbf16>
    %cst_63 = arith.constant dense<0.000000e+00> : vector<128x128xf32>
    %55 = tpu.matmul %52, %54, %cst_63 {dimension_numbers = #tpu.dot_dimension_numbers<[1], [0], [0], [1], [0, 0, 1, 1], [], []>} : vector<128x4xbf16>, vector<4x128xbf16>, vector<128x128xf32> -> vector<128x128xf32>
    %56 = arith.addf %49, %55 : vector<128x128xf32>
    %c0_64 = arith.constant 0 : index
    %c0_65 = arith.constant 0 : index
    %c2_66 = arith.constant 2 : index
    %c2_67 = arith.constant 2 : index
    %c0_68 = arith.constant 0 : index
    %57 = vector.load %arg2[%c0_64, %c0_65, %c2_66, %c2_67, %c0_68] : memref<1x1x10x18x4xbf16, #tpu.memory_space<vmem>>, vector<1x1x8x16x4xbf16>
    %58 = vector.shape_cast %57 : vector<1x1x8x16x4xbf16> to vector<8x16x4xbf16>
    %59 = vector.shape_cast %58 : vector<8x16x4xbf16> to vector<128x4xbf16>
    %c8 = arith.constant 8 : index
    %c0_69 = arith.constant 0 : index
    %c0_70 = arith.constant 0 : index
    %60 = vector.load %arg3[%c8, %c0_69, %c0_70] : memref<9x4x128xbf16, #tpu.memory_space<vmem>>, vector<1x4x128xbf16>
    %61 = vector.shape_cast %60 : vector<1x4x128xbf16> to vector<4x128xbf16>
    %cst_71 = arith.constant dense<0.000000e+00> : vector<128x128xf32>
    %62 = tpu.matmul %59, %61, %cst_71 {dimension_numbers = #tpu.dot_dimension_numbers<[1], [0], [0], [1], [0, 0, 1, 1], [], []>} : vector<128x4xbf16>, vector<4x128xbf16>, vector<128x128xf32> -> vector<128x128xf32>
    %63 = arith.addf %56, %62 : vector<128x128xf32>
    %cst_72 = arith.constant dense<0.000000e+00> : vector<128xf32>
    %64 = vector.multi_reduction <add>, %63, %cst_72 [0] : vector<128x128xf32> to vector<128xf32>
    %65 = vector.shape_cast %64 : vector<128xf32> to vector<1x128xf32>
    %66 = arith.mulf %63, %63 : vector<128x128xf32>
    %cst_73 = arith.constant dense<0.000000e+00> : vector<128xf32>
    %67 = vector.multi_reduction <add>, %66, %cst_73 [0] : vector<128x128xf32> to vector<128xf32>
    %68 = vector.shape_cast %67 : vector<128xf32> to vector<1x128xf32>
    %69 = tpu.concatenate %65, %68 in 0 : vector<1x128xf32>, vector<1x128xf32> -> vector<2x128xf32>
    %c0_74 = arith.constant 0 : index
    %c0_75 = arith.constant 0 : index
    %c0_76 = arith.constant 0 : index
    %c0_77 = arith.constant 0 : index
    %70 = vector.load %arg5[%c0_74, %c0_75, %c0_76, %c0_77] : memref<1x1x2x128xf32, #tpu.memory_space<vmem>>, vector<1x1x2x128xf32>
    %71 = vector.shape_cast %70 : vector<1x1x2x128xf32> to vector<2x128xf32>
    %72 = vector.shape_cast %69 : vector<2x128xf32> to vector<1x1x2x128xf32>
    tpu.vector_store %arg5[%c0_74, %c0_75, %c0_76, %c0_77], %72 {strides = array<i32>} : memref<1x1x2x128xf32, #tpu.memory_space<vmem>>, vector<1x1x2x128xf32>,
    %73 = arith.truncf %63 : vector<128x128xf32> to vector<128x128xbf16>
    %c0_78 = arith.constant 0 : index
    %c0_79 = arith.constant 0 : index
    %c0_80 = arith.constant 0 : index
    %c0_81 = arith.constant 0 : index
    %74 = vector.load %arg4[%c0_78, %c0_79, %c0_80, %c0_81] : memref<1x1x128x128xbf16, #tpu.memory_space<vmem>>, vector<1x1x128x128xbf16>
    %75 = vector.shape_cast %74 : vector<1x1x128x128xbf16> to vector<128x128xbf16>
    %76 = vector.shape_cast %73 : vector<128x128xbf16> to vector<1x1x128x128xbf16>
    tpu.vector_store %arg4[%c0_78, %c0_79, %c0_80, %c0_81], %76 {strides = array<i32>} : memref<1x1x128x128xbf16, #tpu.memory_space<vmem>>, vector<1x1x128x128xbf16>,
    return
  }
  func.func @transform_0(%arg0: i32, %arg1: i32) -> (i32, i32, i32, i32, i32) {
    %c0_i32 = arith.constant 0 : i32
    %c0_i32_0 = arith.constant 0 : i32
    %c0_i32_1 = arith.constant 0 : i32
    %c0_i32_2 = arith.constant 0 : i32
    return %arg0, %arg1, %c0_i32, %c0_i32_0, %c0_i32_1 : i32, i32, i32, i32, i32
  }
  func.func @transform_1(%arg0: i32, %arg1: i32) -> (i32, i32, i32) {
    %c0_i32 = arith.constant 0 : i32
    %c0_i32_0 = arith.constant 0 : i32
    %c0_i32_1 = arith.constant 0 : i32
    %c0_i32_2 = arith.constant 0 : i32
    return %c0_i32, %c0_i32_0, %c0_i32_1 : i32, i32, i32
  }
  func.func @transform_2(%arg0: i32, %arg1: i32) -> (i32, i32, i32, i32) {
    %c0_i32 = arith.constant 0 : i32
    %c0_i32_0 = arith.constant 0 : i32
    %c0_i32_1 = arith.constant 0 : i32
    return %arg0, %arg1, %c0_i32, %c0_i32_0 : i32, i32, i32, i32
  }
  func.func @transform_3(%arg0: i32, %arg1: i32) -> (i32, i32, i32, i32) {
    %c0_i32 = arith.constant 0 : i32
    %c0_i32_0 = arith.constant 0 : i32
    %c0_i32_1 = arith.constant 0 : i32
    return %arg0, %arg1, %c0_i32, %c0_i32_0 : i32, i32, i32, i32
  }
}

</mosaic_0001>

<bundles_post_ra>
// kernel: tpu_custom_call.1
= control target key start
LH: loop header
LB: loop body
LE: loop exit
PB: predicated region body
PF: predicated region fallthrough
CT: control target
= control target key end

     0   :  { %9 = vsyncpa [#allocation3], 0  ;;  %s5013_s0 = inlined_call_operand.vmem [shape: bf16[2,2,10,18,4], index: 0, kind: input, shape index: {}]   ;;  %s5014_s1 = inlined_call_operand.vmem [shape: bf16[9,4,128], index: 1, kind: input, shape index: {}]   ;;  %s5015_s2 = inlined_call_operand.hbm [shape: bf16[2,2,128,128], index: 2, kind: output, shape index: {0}]   ;;  %s5016_s3 = inlined_call_operand.hbm [shape: f32[2,2,2,128], index: 3, kind: output, shape index: {1}]  }
   0x1   :  { %11 = vsyncpa [#allocation3 + $0x1], 0 }
   0x2   :  { %12 = vsyncpa [#allocation5], 0 }
   0x3   :  { %14 = vsyncpa [#allocation5 + $0x1], 0  ;;  %s3970_s12 = smov 0   ;;  %s3972_s13 = smov 0  }
   0x4   :  { %s3974_s14 = smov 0   ;;  %s3976_s15 = smov 0  }
   0x5   :  { %s3978_s16 = smov 0   ;;  %s3980_s17 = smov 0  }
   0x6   :  { %s3982_s18 = smov 0   ;;  %s3984_s19 = smov 0  }
   0x7 LB: > { %s2962_s20 = sadd.s32 4294967295, %s3944_s19   ;;  %s2963_s21 = sadd.s32 4294967294, %s3944_s19   ;;  %s3944_s19 = sphi %s3984_s19, %s20_s19   ;;  %s3940_s18 = sphi %s3982_s18, %s5047_s18   ;;  %s3936_s17 = sphi %s3980_s17, %s5046_s17   ;;  %s3932_s16 = sphi %s3978_s16, %s5045_s16   ;;  %s3928_s15 = sphi %s3976_s15, %s5044_s15   ;;  %s3924_s14 = sphi %s3974_s14, %s5043_s14   ;;  %s3920_s13 = sphi %s3972_s13, %s5042_s13   ;;  %s3916_s12 = sphi %s3970_s12, %s5041_s12  }
   0x8   : > { %s29_s22 = sadd.s32 1, %s3936_s17  ;;  %s32_s23 = sadd.s32 1, %s3940_s18 }
   0x9   : > { %p30_p0 = scmp.ge.s32.totalorder %s29_s22, 2  ;;  %p100_p1 = scmp.ne.s32.totalorder %s3924_s14, %s3920_s13 }
   0xa   : > { %p101_p2 = scmp.eq.s32.totalorder %s2962_s20, 3  ;;  %p106_p5 = scmp.ne.s32.totalorder %s3920_s13, %s3916_s12 }
   0xb   : > { %s5049_s22 = smov (%p30_p0, %s29_s22), 0  ;;  %s5051_s23 = smov (!%p30_p0, %s32_s23), %s3940_s18 }
   0xc   : > { %s86_s24 = ssub.s32 %s3936_s17, %s5049_s22  ;;  %p4021_p3 = por %p101_p2, %p100_p1 }
   0xd   : > { %p34_p4 = scmp.ge.s32.totalorder %s5051_s23, 2  ;;  %p107_p6 = scmp.eq.s32.totalorder %s2963_s21, 3 }
   0xe   : > { %p2966_p7 = scmp.ge.s32.totalorder %s3944_s19, 1  ;;  %p168_p9 = scmp.lt.s32.totalorder %s3944_s19, 5 }
   0xf   : > { %s5053_s23 = smov (%p34_p4, %s5051_s23), 0  ;;  %p4030_p8 = por %p107_p6, %p106_p5 }
  0x10   : > { %s85_s27 = ssub.s32 %s3940_s18, %s5053_s23  ;;  %s90_s28 = sadd.s32 1, %s3924_s14 }
  0x11   : > { %s87_s29 = sor.u32 %s86_s24, %s85_s27  ;;  %p169_p10 = pnand %p2966_p7, %p168_p9 }
  0x12   : > { %p88_p11 = scmp.eq.s32.totalorder %s87_s29, 0 }
  0x13   : > { %172 = sbr.rel (%p169_p10) target bundleno = 475 (0x1db), region = 28 }
  0x14   : > { %s4039_s30 = scalar_select %p88_p11, %s3924_s14, %s90_s28  }
  0x1a   : > { %v2970_v0 = vld [vmem:[%s5014_s1 + $0x2] sm:$0x3]  ;;  %vm482_vm0 = vcmask 1041408   ;;  %v3085_v1 = vld [vmem:[%s5014_s1 + $0x8] sm:$0x3]  ;;  %p201_p12 = scmp.lt.s32.totalorder %s3932_s16, 1 }
  0x1b   : > { %3703 = vmatprep.subr.msk.bf16.mxu1 %vm482_vm0, %v2970_v0  ;;  %3707 = vmatprep.subr.msk.bf16.mxu0 %vm482_vm0, %v3085_v1  ;;  %v484_v2 = vsel %vm482_vm0, %v2970_v0, 0  ;;  %v4052_v3 = vsel %vm482_vm0, %v3085_v1, 0  ;;  %p203_p13 = scmp.lt.s32.totalorder %s3928_s15, 1  ;;  %v227_v4 = vld [vmem:[%s5014_s1] sm:$0x3]  ;;  %vm457_vm3 = vcmask 31744  }
  0x1c   : > { %3412 = vmatpush3.bf16.msra.mxu1 %v484_v2  ;;  %3484 = vmatpush3.bf16.msra.mxu0 %v4052_v3  ;;  %s202_s8 = scalar_select %p201_p12, %s3932_s16, 1  ;;  %v3118_v5 = vld [vmem:[%s5014_s1 + $0xa] sm:$0x3]  ;;  %vm236_vm1 = vsmask.f32 3328  ;;  %v4093_v17 = vsel %vm482_vm0, %v227_v4, 0 }
  0x1d   : > { %s204_s11 = scalar_select %p203_p13, %s3928_s15, 1  ;;  %3704 = vmatprep.subr.msk.bf16.mxu1 %vm482_vm0, %v227_v4  ;;  %3709 = vmatprep.subr.msk.bf16.mxu0 %vm482_vm0, %v3118_v5  ;;  %vm237_vm2 = vsmask.f32 7440  ;;  %v4099_v26 = vld [vmem:[%s5014_s1 + $0xc] sm:$0x3]  ;;  %v4116_v37 = vsel %vm482_vm0, %v3118_v5, 0 }
  0x1e   : > { %s3714_s24 = smul.u32 60, %s202_s8  ;;  %vm4108_vm4 = vmor %vm236_vm1, %vm237_vm2  ;;  %v4120_v41 = vsel %vm482_vm0, %v4099_v26, 0  ;;  %vm771_vm5 = vcmask 1042432   ;;  %vm772_vm6 = vcmask 1046532   ;;  %s4906_s5 = sand.u32 1, %s3920_s13  }
  0x1f   : > { %s3713_s27 = smul.u32 30, %s204_s11  ;;  %vm4263_vm7 = vmor %vm771_vm5, %vm772_vm6  ;;  %s3260_s8 = sshll.u32 %s3928_s15, 4 }
  0x20   : > { %s3261_s9 = sshll.u32 %s3932_s16, 5  ;;  %s3946_s4 = smov [#allocation2]  }
  0x21   : > { %s207_s28 = sadd.s32 %s3714_s24, %s3713_s27  ;;  %s2825_s10 = sadd.s32 %s3261_s9, %s3260_s8 }
  0x22   : > { %s2969_s29 = sshll.u32 %s207_s28, 2  ;;  %s3262_s11 = sshll.u32 %s2825_s10, 6 }
  0x23   : > { %s4069_s6 = scalar_lea.vmem %s5013_s0, %s2969_s29  ;;  %s4923_s27 = scalar_lea.hbm %s5015_s2, %s3262_s11 }
  0x24   : > { %v4072_v6 = vld [vmem:[%s4069_s6] sm:$0xf]  ;;  %v4075_v7 = vld [vmem:[%s4069_s6 + $0x4] sm:$0xf]  ;;  %v4078_v8 = vld [vmem:[%s4069_s6 + $0x8] sm:$0x1] }
  0x25   : > { %v240_v9 = vshrl.u32 %v4072_v6, 16  ;;  %v243_v10 = vshll.u32 %v4072_v6, 16  ;;  %v249_v11 = vshll.u32 %v4075_v7, 16  ;;  %v253_v12 = vshrl.u32 %v4075_v7, 16  ;;  %v3061_v13 = vld [vmem:[%s4069_s6 + $0xc] sm:$0xf] }
  0x26   : > { %v259_v14 = vshll.u32 %v4078_v8, 16  ;;  %v4087_v15 = vld [vmem:[%s4069_s6 + $0x10] sm:$0xf]  ;;  %v4090_v16 = vld [vmem:[%s4069_s6 + $0x14] sm:$0x1]  ;;  %v1220_v23 = vshrl.u32 %v3061_v13, 16 }
  0x27   : > { %v242_v18 = vrot.slane %v240_v9, 4  ;;  %v245_v19 = vrot.slane %v243_v10, 5  ;;  %v251_v20 = vrot.slane %v249_v11, 5  ;;  %v255_v21 = vrot.slane %v253_v12, 4  ;;  %v4104_v31 = vld [vmem:[%s4069_s6 + $0xc] sm:$0xf] }
  0x28   : > { %v261_v22 = vrot.slane %v259_v14, 5  ;;  %v1223_v24 = vshll.u32 %v3061_v13, 16  ;;  %v1229_v25 = vshll.u32 %v4087_v15, 16  ;;  %v1233_v29 = vshrl.u32 %v4087_v15, 16  ;;  %v4113_v36 = vld [vmem:[%s4069_s6 + $0x10] sm:$0xf] }
  0x29   : > { %v246_v27 = vor.u32 %v245_v19, %v242_v18  ;;  %v256_v28 = vor.u32 %v255_v21, %v251_v20  ;;  %v1239_v30 = vshll.u32 %v4090_v16, 16  ;;  %v1222_v33 = vrot.slane %v1220_v23, 4  ;;  %v4123_v44 = vld [vmem:[%s4069_s6 + $0x14] sm:$0x1]  ;;  %v3064_v55 = vld [vmem:[%s4069_s6 + $0x18] sm:$0xf] }
  0x2a   : > { %v1225_v34 = vrot.slane %v1223_v24, 5  ;;  %v1231_v35 = vrot.slane %v1229_v25, 5  ;;  %v1235_v40 = vrot.slane %v1233_v29, 4  ;;  %v264_v45 = vshrl.u32 %v4104_v31, 16  ;;  %v4136_v60 = vld [vmem:[%s4069_s6 + $0x1c] sm:$0xf] }
  0x2b   : > { %v247_v38 = vrot.slane %v246_v27, 4  ;;  %v257_v39 = vrot.slane %v256_v28, 4  ;;  %v1241_v43 = vrot.slane %v1239_v30, 5  ;;  %v267_v46 = vshll.u32 %v4104_v31, 16  ;;  %v4144_v1 = vld [vmem:[%s4069_s6 + $0x20] sm:$0x1] }
  0x2c   : > { %v1226_v42 = vor.u32 %v1225_v34, %v1222_v33  ;;  %v1236_v49 = vor.u32 %v1235_v40, %v1231_v35  ;;  %v273_v50 = vshll.u32 %v4113_v36, 16  ;;  %v266_v53 = vrot.slane %v264_v45, 4  ;;  %v4152_v21 = vld [vmem:[%s4069_s6 + $0x18] sm:$0xf]  ;;  %v4159_v27 = vld [vmem:[%s4069_s6 + $0x1c] sm:$0xf] }
  0x2d   : > { %v252_v47 = vsel %vm4108_vm4, %v247_v38, %v251_v20  ;;  %v262_v48 = vsel %vm4108_vm4, %v257_v39, %v261_v22  ;;  %v269_v54 = vrot.slane %v267_v46, 5  ;;  %v277_v58 = vshrl.u32 %v4113_v36, 16  ;;  %v4167_v38 = vld [vmem:[%s4069_s6 + $0x20] sm:$0x1]  ;;  %s2808_s28 = scalar_lea.sflag [#allocation3], %s4906_s5 }
  0x2e   : > { %v2971_v51 = vcombine.low %v252_v47, %v262_v48  ;;  %v1227_v52 = vrot.slane %v1226_v42, 4  ;;  %v1237_v56 = vrot.slane %v1236_v49, 4  ;;  %v275_v57 = vrot.slane %v273_v50, 5  ;;  %v3067_v47 = vld [vmem:[%s4069_s6 + $0x24] sm:$0xf] }
  0x2f   : > { %v283_v59 = vshll.u32 %v4123_v44, 16  ;;  %v1611_v62 = vrot.slane %v4087_v15, 5  ;;  %v1614_v63 = vrot.slane %v4090_v16, 5  ;;  %v270_v0 = vor.u32 %v269_v54, %v266_v53 }
  0x30   : > { %3413 = vmatprep.mubr.msk.bf16.mxu1 %vm457_vm3, %v2971_v51  ;;  %v1232_v61 = vsel %vm4108_vm4, %v1227_v52, %v1231_v35  ;;  %v1242_v2 = vsel %vm4108_vm4, %v1237_v56, %v1241_v43  ;;  %v279_v4 = vrot.slane %v277_v58, 4  ;;  %v1244_v9 = vshrl.u32 %v3064_v55, 16  ;;  %v4177_v52 = vld [vmem:[%s4069_s6 + $0x28] sm:$0xf] }
  0x31   : > { %v285_v5 = vrot.slane %v283_v59, 5  ;;  %v3086_v10 = vcombine.low %v1232_v61, %v1242_v2  ;;  %v271_v11 = vrot.slane %v270_v0, 4  ;;  %v1247_v12 = vshll.u32 %v3064_v55, 16  ;;  %v4189_v61 = vld [vmem:[%s4069_s6 + $0x2c] sm:$0x1] }
  0x32   : > { %v1253_v13 = vshll.u32 %v4136_v60, 16  ;;  %v280_v14 = vor.u32 %v279_v4, %v275_v57  ;;  %v1246_v18 = vrot.slane %v1244_v9, 4  ;;  %v1257_v19 = vshrl.u32 %v4136_v60, 16 }
  0x33   : > { %v1263_v20 = vshll.u32 %v4144_v1, 16  ;;  %3485 = vmatprep.mubr.msk.bf16.mxu0 %vm457_vm3, %v3086_v10  ;;  %v276_v22 = vsel %vm4108_vm4, %v271_v11, %v275_v57  ;;  %v1249_v23 = vrot.slane %v1247_v12, 5  ;;  %v1618_v25 = vrot.slane %v4136_v60, 5  ;;  %v4183_v57 = vld [vmem:[%s5014_s1 + $0x4] sm:$0x3] }
  0x34   : > { %v1255_v24 = vrot.slane %v1253_v13, 5  ;;  %v281_v28 = vrot.slane %v280_v14, 4  ;;  %v1259_v29 = vrot.slane %v1257_v19, 4  ;;  %v1621_v33 = vrot.slane %v4144_v1, 5  ;;  %v4196_v11 = vld [vmem:[%s4069_s6 + $0x24] sm:$0xf] }
  0x35   : > { %v1265_v30 = vrot.slane %v1263_v20, 5  ;;  %v1250_v34 = vor.u32 %v1249_v23, %v1246_v18  ;;  %v4164_v35 = vrot.slane %v1618_v25, 4  ;;  %v288_v39 = vshrl.u32 %v4152_v21, 16  ;;  %v4199_v19 = vld [vmem:[%s4069_s6 + $0x28] sm:$0xf] }
  0x36   : > { %v291_v40 = vshll.u32 %v4152_v21, 16  ;;  %v286_v42 = vsel %vm4108_vm4, %v281_v28, %v285_v5  ;;  %v1260_v43 = vor.u32 %v1259_v29, %v1255_v24  ;;  %v297_v45 = vshll.u32 %v4159_v27, 16  ;;  %v4209_v29 = vld [vmem:[%s4069_s6 + $0x2c] sm:$0x1] }
  0x37   : > { %v301_v46 = vshrl.u32 %v4159_v27, 16  ;;  %v2972_v48 = vcombine.low %v276_v22, %v286_v42  ;;  %v1251_v49 = vrot.slane %v1250_v34, 4  ;;  %v290_v50 = vrot.slane %v288_v39, 4 }
  0x38   : > { %v293_v51 = vrot.slane %v291_v40, 5  ;;  %v1261_v53 = vrot.slane %v1260_v43, 4  ;;  %v299_v54 = vrot.slane %v297_v45, 5  ;;  %v307_v56 = vshll.u32 %v4167_v38, 16  ;;  %v3070_v45 = vld [vmem:[%s4069_s6 + $0x30] sm:$0xf] }
  0x39   : > { %v303_v55 = vrot.slane %v301_v46, 4  ;;  %3414 = vmatmul.mubr.msk.bf16.vlgmr.msra.gmra.mrb[0].mxu1 %vm457_vm3, %v2972_v48  ;;  %v1256_v58 = vsel %vm4108_vm4, %v1251_v49, %v1255_v24  ;;  %v1268_v0 = vshrl.u32 %v3067_v47, 16  ;;  %v1271_v2 = vshll.u32 %v3067_v47, 16 }
  0x3a   : > { %v294_v59 = vor.u32 %v293_v51, %v290_v50  ;;  %3430 = vmatpush3.bf16.msra.mxu1 %v4093_v17  ;;  %v1266_v4 = vsel %vm4108_vm4, %v1261_v53, %v1265_v30  ;;  %v309_v9 = vrot.slane %v307_v56, 5  ;;  %v1277_v10 = vshll.u32 %v4177_v52, 16  ;;  %v4219_v50 = vld [vmem:[%s4069_s6 + $0x34] sm:$0xf] }
  0x3b   : > { %v304_v5 = vor.u32 %v303_v55, %v299_v54  ;;  %v3087_v12 = vcombine.low %v1256_v58, %v1266_v4  ;;  %v1270_v14 = vrot.slane %v1268_v0, 4  ;;  %v1273_v18 = vrot.slane %v1271_v2, 5  ;;  %3705 = vmatprep.subr.msk.bf16.mxu1 %vm482_vm0, %v4183_v57  ;;  %v4229_v58 = vld [vmem:[%s4069_s6 + $0x38] sm:$0x1] }
  0x3c   : > { %v295_v13 = vrot.slane %v294_v59, 4  ;;  %v1279_v20 = vrot.slane %v1277_v10, 5  ;;  %v1281_v22 = vshrl.u32 %v4177_v52, 16  ;;  %v1287_v23 = vshll.u32 %v4189_v61, 16 }
  0x3d   : > { %v305_v17 = vrot.slane %v304_v5, 4  ;;  %3486 = vmatmul.mubr.msk.bf16.vlgmr.msra.gmra.mrb[0].mxu0 %vm457_vm3, %v3087_v12  ;;  %v1274_v28 = vor.u32 %v1273_v18, %v1270_v14  ;;  %v312_v30 = vshrl.u32 %v4196_v11, 16  ;;  %v315_v34 = vshll.u32 %v4196_v11, 16  ;;  %v4234_v14 = vld [vmem:[%s4069_s6 + $0x30] sm:$0xf] }
  0x3e   : > { %v300_v24 = vsel %vm4108_vm4, %v295_v13, %v299_v54  ;;  %3502 = vmatpush3.bf16.msra.mxu0 %v4116_v37  ;;  %v1283_v40 = vrot.slane %v1281_v22, 4  ;;  %v1289_v42 = vrot.slane %v1287_v23, 5  ;;  %v321_v43 = vshll.u32 %v4199_v19, 16  ;;  %v4240_v23 = vld [vmem:[%s4069_s6 + $0x34] sm:$0xf] }
  0x3f   : > { %v310_v39 = vsel %vm4108_vm4, %v305_v17, %v309_v9  ;;  %v1275_v47 = vrot.slane %v1274_v28, 4  ;;  %v314_v48 = vrot.slane %v312_v30, 4  ;;  %v317_v49 = vrot.slane %v315_v34, 5  ;;  %3710 = vmatprep.subr.msk.bf16.mxu0 %vm482_vm0, %v4099_v26 }
  0x40   : > { %v2973_v46 = vcombine.low %v300_v24, %v310_v39  ;;  %v1284_v37 = vor.u32 %v1283_v40, %v1279_v20  ;;  %v323_v51 = vrot.slane %v321_v43, 5  ;;  %v325_v53 = vshrl.u32 %v4199_v19, 16  ;;  %v4245_v39 = vld [vmem:[%s4069_s6 + $0x38] sm:$0x1] }
  0x41   : > { %v331_v54 = vshll.u32 %v4209_v29, 16  ;;  %v1280_v55 = vsel %vm4108_vm4, %v1275_v47, %v1279_v20  ;;  %v318_v56 = vor.u32 %v317_v49, %v314_v48  ;;  %v1292_v59 = vshrl.u32 %v3070_v45, 16 }
  0x42   : > { %3417 = vmatprep.mubr.msk.bf16.mxu1 %vm457_vm3, %v2973_v46  ;;  %v1295_v0 = vshll.u32 %v3070_v45, 16  ;;  %v1285_v2 = vrot.slane %v1284_v37, 4  ;;  %v327_v26 = vrot.slane %v325_v53, 4  ;;  %v1301_v5 = vshll.u32 %v4219_v50, 16  ;;  %v3102_v37 = vld [vmem:[%s4069_s6 + $0xc] sm:$0xe] }
  0x43   : > { %v333_v4 = vrot.slane %v331_v54, 5  ;;  %v319_v9 = vrot.slane %v318_v56, 4  ;;  %v1294_v10 = vrot.slane %v1292_v59, 4  ;;  %v1305_v13 = vshrl.u32 %v4219_v50, 16  ;;  %v4257_v56 = vld [vmem:[%s4069_s6 + $0x3c] sm:$0xf] }
  0x44   : > { %v1297_v12 = vrot.slane %v1295_v0, 5  ;;  %v1290_v18 = vsel %vm4108_vm4, %v1285_v2, %v1289_v42  ;;  %v328_v17 = vor.u32 %v327_v26, %v323_v51  ;;  %v1303_v20 = vrot.slane %v1301_v5, 5 }
  0x45   : > { %v1311_v22 = vshll.u32 %v4229_v58, 16  ;;  %v3088_v24 = vcombine.low %v1280_v55, %v1290_v18  ;;  %v324_v28 = vsel %vm4108_vm4, %v319_v9, %v323_v51  ;;  %v1307_v34 = vrot.slane %v1305_v13, 4  ;;  %v4271_v18 = vld [vmem:[%s4069_s6 + $0x44] sm:$0x1] }
  0x46   : > { %v1298_v30 = vor.u32 %v1297_v12, %v1294_v10  ;;  %v329_v40 = vrot.slane %v328_v17, 4  ;;  %v336_v42 = vshrl.u32 %v4234_v14, 16  ;;  %v339_v45 = vshll.u32 %v4234_v14, 16  ;;  %v3103_v17 = vld [vmem:[%s4069_s6 + $0x18] sm:$0xe] }
  0x47   : > { %v1313_v43 = vrot.slane %v1311_v22, 5  ;;  %3489 = vmatprep.mubr.msk.bf16.mxu0 %vm457_vm3, %v3088_v24  ;;  %v1308_v47 = vor.u32 %v1307_v34, %v1303_v20  ;;  %v345_v48 = vshll.u32 %v4240_v23, 16  ;;  %v349_v49 = vshrl.u32 %v4240_v23, 16 }
  0x48   : > { %v1299_v46 = vrot.slane %v1298_v30, 4  ;;  %v334_v51 = vsel %vm4108_vm4, %v329_v40, %v333_v4  ;;  %v338_v53 = vrot.slane %v336_v42, 4  ;;  %v341_v54 = vrot.slane %v339_v45, 5  ;;  %v4268_v4 = vld [vmem:[%s4069_s6 + $0x40] sm:$0xf] }
  0x49   : > { %v355_v55 = vshll.u32 %v4245_v39, 16  ;;  %v2974_v59 = vcombine.low %v324_v28, %v334_v51  ;;  %v1309_v2 = vrot.slane %v1308_v47, 4  ;;  %v347_v26 = vrot.slane %v345_v48, 5  ;;  %v4282_v30 = vld [vmem:[%s4069_s6 + $0x48] sm:$0xf] }
  0x4a   : > { %v1304_v0 = vsel %vm4108_vm4, %v1299_v46, %v1303_v20  ;;  %v342_v9 = vor.u32 %v341_v54, %v338_v53  ;;  %v351_v10 = vrot.slane %v349_v49, 4  ;;  %v3110_v13 = vrot.slane %v3102_v37, 9 }
  0x4b   : > { %v357_v12 = vrot.slane %v355_v55, 5  ;;  %3418 = vmatmul.mubr.msk.bf16.gmra.mrb[4].mxu1 %vm457_vm3, %v2974_v59  ;;  %v1314_v20 = vsel %vm4108_vm4, %v1309_v2, %v1313_v43  ;;  %v1613_v22 = vrot.slane %v1611_v62, 4  ;;  %v360_v24 = vshrl.u32 %v4257_v56, 16  ;;  %v4302_v55 = vld [vmem:[%s4069_s6 + $0x50] sm:$0x1] }
  0x4c   : > { %v363_v28 = vshll.u32 %v4257_v56, 16  ;;  %v3089_v34 = vcombine.low %v1304_v0, %v1314_v20  ;;  %v343_v40 = vrot.slane %v342_v9, 4  ;;  %v352_v42 = vor.u32 %v351_v10, %v347_v26 }
  0x4d   : > { %v1612_v45 = vsel %vm4263_vm7, %v3110_v13, %v1611_v62  ;;  %v1615_v43 = vsel %vm4263_vm7, %v1613_v22, %v1614_v63  ;;  %v362_v46 = vrot.slane %v360_v24, 4  ;;  %v369_v48 = vshll.u32 %v4268_v4, 16  ;;  %v4298_v62 = vld [vmem:[%s4069_s6 + $0x4c] sm:$0xf] }
  0x4e   : > { %v365_v47 = vrot.slane %v363_v28, 5  ;;  %3490 = vmatmul.mubr.msk.bf16.gmra.mrb[4].mxu0 %vm457_vm3, %v3089_v34  ;;  %v348_v49 = vsel %vm4108_vm4, %v343_v40, %v347_v26  ;;  %v353_v37 = vrot.slane %v352_v42, 4  ;;  %v3119_v15 = vcombine.low %v1612_v45, %v1615_v43  ;;  %v4320_v28 = vld [vmem:[%s4069_s6 + $0x54] sm:$0xf]  ;;  %v4331_v34 = vld [vmem:[%s5014_s1 + $0xe] sm:$0x3] }
  0x4f   : > { %v373_v51 = vshrl.u32 %v4268_v4, 16  ;;  %v371_v53 = vrot.slane %v369_v48, 5  ;;  %v379_v63 = vshll.u32 %v4271_v18, 16  ;;  %v3111_v54 = vrot.slane %v3103_v17, 9 }
  0x50   : > { %v366_v16 = vor.u32 %v365_v47, %v362_v46  ;;  %v358_v59 = vsel %vm4108_vm4, %v353_v37, %v357_v12  ;;  %3503 = vmatprep.mubr.msk.bf16.mxu0 %vm457_vm3, %v3119_v15  ;;  %v1622_v2 = vsel %vm4263_vm7, %v4164_v35, %v1621_v33  ;;  %v384_v26 = vshrl.u32 %v4282_v30, 16  ;;  %v3104_v12 = vld [vmem:[%s4069_s6 + $0x24] sm:$0xe]  ;;  %v4336_v37 = vld [vmem:[%s4069_s6 + $0x58] sm:$0xf] }
  0x51   : > { %v375_v0 = vrot.slane %v373_v51, 4  ;;  %v2975_v9 = vcombine.low %v348_v49, %v358_v59  ;;  %v381_v13 = vrot.slane %v379_v63, 5  ;;  %v1619_v17 = vsel %vm4263_vm7, %v3111_v54, %v1618_v25  ;;  %v4345_v54 = vld [vmem:[%s4069_s6 + $0x5c] sm:$0x1] }
  0x52   : > { %v367_v10 = vrot.slane %v366_v16, 4  ;;  %v3120_v22 = vcombine.low %v1619_v17, %v1622_v2  ;;  %v386_v24 = vrot.slane %v384_v26, 4  ;;  %v387_v1 = vshll.u32 %v4282_v30, 16 }
  0x53   : > { %v376_v20 = vor.u32 %v375_v0, %v371_v53  ;;  %3421 = vmatprep.mubr.msk.bf16.mxu1 %vm457_vm3, %v2975_v9  ;;  %v393_v35 = vshll.u32 %v4298_v62, 16  ;;  %v397_v60 = vshrl.u32 %v4298_v62, 16  ;;  %v403_v25 = vshll.u32 %v4302_v55, 16 }
  0x54   : > { %v372_v33 = vsel %vm4108_vm4, %v367_v10, %v371_v53  ;;  %v389_v42 = vrot.slane %v387_v1, 5  ;;  %v3112_v45 = vrot.slane %v3104_v12, 9  ;;  %v1625_v43 = vrot.slane %v4177_v52, 5  ;;  %v3105_v10 = vld [vmem:[%s4069_s6 + $0x30] sm:$0xe] }
  0x55   : > { %v377_v40 = vrot.slane %v376_v20, 4  ;;  %v395_v46 = vrot.slane %v393_v35, 5  ;;  %v399_v47 = vrot.slane %v397_v60, 4  ;;  %v405_v48 = vrot.slane %v403_v25, 5 }
  0x56   : > { %v1628_v49 = vrot.slane %v4189_v61, 5  ;;  %3504 = vmatmul.mubr.msk.bf16.vlgmr.msra.gmra.mrb[0].mxu0 %vm457_vm3, %v3120_v22  ;;  %v390_v51 = vor.u32 %v389_v42, %v386_v24  ;;  %v1626_v16 = vsel %vm4263_vm7, %v3112_v45, %v1625_v43  ;;  %v1627_v53 = vrot.slane %v1625_v43, 4  ;;  %v4366_v42 = vld [vmem:[%s4069_s6 + $0x40] sm:$0xf]  ;;  %v4369_v45 = vld [vmem:[%s4069_s6 + $0x44] sm:$0x1] }
  0x57   : > { %v382_v15 = vsel %vm4108_vm4, %v377_v40, %v381_v13  ;;  %3520 = vmatpush3.bf16.msra.mxu0 %v4120_v41  ;;  %v400_v52 = vor.u32 %v399_v47, %v395_v46  ;;  %v408_v61 = vshrl.u32 %v4320_v28, 16  ;;  %v411_v59 = vshll.u32 %v4320_v28, 16 }
  0x58   : > { %v2976_v63 = vcombine.low %v372_v33, %v382_v15  ;;  %v391_v0 = vrot.slane %v390_v51, 4  ;;  %v1629_v2 = vsel %vm4263_vm7, %v1627_v53, %v1628_v49  ;;  %v417_v26 = vshll.u32 %v4336_v37, 16  ;;  %3711 = vmatprep.subr.msk.bf16.mxu0 %vm482_vm0, %v4331_v34  ;;  %v3106_v33 = vld [vmem:[%s4069_s6 + $0x3c] sm:$0xe] }
  0x59   : > { %v421_v9 = vshrl.u32 %v4336_v37, 16  ;;  %v401_v41 = vrot.slane %v400_v52, 4  ;;  %v3121_v13 = vcombine.low %v1626_v16, %v1629_v2  ;;  %v410_v17 = vrot.slane %v408_v61, 4  ;;  %v3107_v2 = vld [vmem:[%s4069_s6 + $0x48] sm:$0xe] }
  0x5a   : > { %3422 = vmatmul.mubr.msk.bf16.gmra.mrb[8].mxu1 %vm457_vm3, %v2976_v63  ;;  %v413_v12 = vrot.slane %v411_v59, 5  ;;  %v396_v20 = vsel %vm4108_vm4, %v391_v0, %v395_v46  ;;  %v419_v22 = vrot.slane %v417_v26, 5  ;;  %v427_v1 = vshll.u32 %v4345_v54, 16  ;;  %v4384_v59 = vld [vmem:[%s4069_s6 + $0x4c] sm:$0xf] }
  0x5b   : > { %v423_v24 = vrot.slane %v421_v9, 4  ;;  %v406_v35 = vsel %vm4108_vm4, %v401_v41, %v405_v48  ;;  %3507 = vmatprep.mubr.msk.bf16.mxu0 %vm457_vm3, %v3121_v13  ;;  %v3113_v25 = vrot.slane %v3105_v10, 9  ;;  %v1632_v40 = vrot.slane %v4219_v50, 5  ;;  %v4387_v0 = vld [vmem:[%s4069_s6 + $0x50] sm:$0x1] }
  0x5c   : > { %v414_v60 = vor.u32 %v413_v12, %v410_v17  ;;  %v2977_v43 = vcombine.low %v396_v20, %v406_v35  ;;  %v429_v47 = vrot.slane %v427_v1, 5  ;;  %v1635_v49 = vrot.slane %v4229_v58, 5  ;;  %v4395_v17 = vld [vmem:[%s4069_s6 + $0x58] sm:$0xf]  ;;  %v4398_v12 = vld [vmem:[%s4069_s6 + $0x5c] sm:$0x1] }
  0x5d   : > { %v424_v46 = vor.u32 %v423_v24, %v419_v22  ;;  %v1633_v48 = vsel %vm4263_vm7, %v3113_v25, %v1632_v40  ;;  %v1634_v51 = vrot.slane %v1632_v40, 4  ;;  %v3114_v16 = vrot.slane %v3106_v33, 9  ;;  %5028 = vst [vmem:[#allocation8_spill] sm:$0xff] %v4398_v12  ;;  %v4408_v35 = vld [vmem:[%s4069_s6 + $0x64] sm:$0xf] }
  0x5e   : > { %v415_v15 = vrot.slane %v414_v60, 4  ;;  %3425 = vmatprep.mubr.msk.bf16.mxu1 %vm457_vm3, %v2977_v43  ;;  %v1639_v53 = vrot.slane %v4366_v42, 5  ;;  %v1642_v63 = vrot.slane %v4369_v45, 5  ;;  %v2987_v61 = vcombine.low %v4072_v6, %v4075_v7  ;;  %v3108_v6 = vld [vmem:[%s4069_s6 + $0x54] sm:$0xe]  ;;  %5029 = vst [vmem:[#allocation9_spill] sm:$0xff] %v4408_v35 }
  0x5f   : > { %v425_v50 = vrot.slane %v424_v46, 4  ;;  %v1636_v58 = vsel %vm4263_vm7, %v1634_v51, %v1635_v49  ;;  %v1646_v24 = vrot.slane %v4384_v59, 5  ;;  %v1649_v1 = vrot.slane %v4387_v0, 5  ;;  %v4411_v60 = vld [vmem:[%s4069_s6 + $0x68] sm:$0x1] }
  0x60   : > { %v420_v52 = vsel %vm4108_vm4, %v415_v15, %v419_v22  ;;  %v3122_v9 = vcombine.low %v1633_v48, %v1636_v58  ;;  %v1640_v10 = vsel %vm4263_vm7, %v3114_v16, %v1639_v53  ;;  %v1641_v41 = vrot.slane %v1639_v53, 4  ;;  %5030 = vst [vmem:[#allocation10_spill] sm:$0xff] %v4411_v60 }
  0x61   : > { %v430_v26 = vsel %vm4108_vm4, %v425_v50, %v429_v47  ;;  %v3115_v22 = vrot.slane %v3107_v2, 9  ;;  %v1648_v40 = vrot.slane %v1646_v24, 4  ;;  %v3116_v43 = vrot.slane %v3108_v6, 9  ;;  %v3109_v47 = vld [vmem:[%s4069_s6 + $0x60] sm:$0xe] }
  0x62   : > { %v2978_v13 = vcombine.low %v420_v52, %v430_v26  ;;  %3508 = vmatmul.mubr.msk.bf16.gmra.mrb[4].mxu0 %vm457_vm3, %v3122_v9  ;;  %v1643_v20 = vsel %vm4263_vm7, %v1641_v41, %v1642_v63  ;;  %v1653_v46 = vrot.slane %v4395_v17, 5  ;;  %v783_v49 = vrot.slane %v4113_v36, 5  ;;  %v749_v2 = vld [vmem:[%s4069_s6 + $0x18] sm:$0xe]  ;;  %v4443_v6 = vld [vmem:[%s5014_s1 + $0x6] sm:$0x3] }
  0x63   : > { %v3123_v33 = vcombine.low %v1640_v10, %v1643_v20  ;;  %v1647_v25 = vsel %vm4263_vm7, %v3115_v22, %v1646_v24  ;;  %v1656_v15 = vrot.slane %v4398_v12, 5  ;;  %v1650_v48 = vsel %vm4263_vm7, %v1648_v40, %v1649_v1  ;;  %v751_v1 = vld [vmem:[%s4069_s6 + $0x30] sm:$0xe] }
  0x64   : > { %3426 = vmatmul.mubr.msk.bf16.gmra.mrb[12].mxu1 %vm457_vm3, %v2978_v13  ;;  %v1654_v51 = vsel %vm4263_vm7, %v3116_v43, %v1653_v46  ;;  %v1655_v16 = vrot.slane %v1653_v46, 4  ;;  %v1660_v50 = vrot.slane %v4408_v35, 5  ;;  %v2988_v53 = vcombine.low %v4104_v31, %v4113_v36  ;;  %v750_v36 = vld [vmem:[%s4069_s6 + $0x24] sm:$0xe]  ;;  %v4717_v12 = vld [vmem:[%s4069_s6 + $0x70] sm:$0xf] }
  0x65   : > { %3431 = vmatprep.mubr.msk.bf16.mxu1 %vm457_vm3, %v2987_v61  ;;  %3511 = vmatprep.mubr.msk.bf16.mxu0 %vm457_vm3, %v3123_v33  ;;  %v3124_v63 = vcombine.low %v1647_v25, %v1650_v48  ;;  %v3117_v52 = vrot.slane %v3109_v47, 9  ;;  %v1663_v58 = vrot.slane %v4411_v60, 5  ;;  %v748_v61 = vld [vmem:[%s4069_s6 + $0xc] sm:$0xe]  ;;  %v786_v26 = vrot.slane %v4123_v44, 5 }
  0x66   : > { %v2989_v9 = vcombine.low %v4152_v21, %v4159_v27  ;;  %v1657_v10 = vsel %vm4263_vm7, %v1655_v16, %v1656_v15  ;;  %v1662_v41 = vrot.slane %v1660_v50, 4  ;;  %v881_v13 = vsel %vm482_vm0, %v4183_v57, 0  ;;  %v3798_v16 = vld [vmem:[%s4069_s6 + $0x18] sm:$0xff]   ;;  %v4689_v60 = vld [vmem:[%s4069_s6 + $0x64] sm:$0xf] }
  0x67   : > { %v3125_v31 = vcombine.low %v1654_v51, %v1657_v10  ;;  %v3004_v44 = vrot.slane %v748_v61, 9  ;;  %v785_v20 = vrot.slane %v783_v49, 4  ;;  %v3005_v21 = vrot.slane %v749_v2, 9  ;;  %5031 = vst [vmem:[#allocation11_spill] sm:$0xff] %v4689_v60 }
  0x68   : > { %v1661_v22 = vsel %vm4263_vm7, %v3117_v52, %v1660_v50  ;;  %v1664_v57 = vsel %vm4263_vm7, %v1662_v41, %v1663_v58  ;;  %v790_v24 = vrot.slane %v4159_v27, 5  ;;  %v793_v40 = vrot.slane %v4167_v38, 5 }
  0x69   : > { %v4456_v33 = vsel %vm4263_vm7, %v3004_v44, %v783_v49  ;;  %v4460_v25 = vsel %vm4263_vm7, %v785_v20, %v786_v26  ;;  %v3006_v43 = vrot.slane %v750_v36, 9  ;;  %v3126_v49 = vcombine.low %v1661_v22, %v1664_v57  ;;  %v3168_v26 = vld [vmem:[%s4069_s6 + $0x18] sm:$0xf]  ;;  %v3800_v57 = vld [vmem:[%s4069_s6 + $0x24] sm:$0xff]  }
  0x6a   : > { %3512 = vmatmul.mubr.msk.bf16.gmra.mrb[8].mxu0 %vm457_vm3, %v3124_v63  ;;  %v3013_v27 = vcombine.low %v4456_v33, %v4460_v25  ;;  %v4469_v46 = vsel %vm4263_vm7, %v3005_v21, %v790_v24  ;;  %v792_v47 = vrot.slane %v790_v24, 4  ;;  %v797_v15 = vrot.slane %v4199_v19, 5 }
  0x6b   : > { %3515 = vmatprep.mubr.msk.bf16.mxu0 %vm457_vm3, %v3125_v31  ;;  %v800_v48 = vrot.slane %v4209_v29, 5  ;;  %v3007_v38 = vrot.slane %v751_v1, 9  ;;  %v2990_v51 = vcombine.low %v4196_v11, %v4199_v19  ;;  %v807_v63 = vrot.slane %v4245_v39, 5  ;;  %v752_v19 = vld [vmem:[%s4069_s6 + $0x3c] sm:$0xe] }
  0x6c   : > { %3432 = vmatmul.mubr.msk.bf16.vlgmr.msra.gmra.mrb[0].mxu1 %vm457_vm3, %v2988_v53  ;;  %v4478_v50 = vsel %vm4263_vm7, %v792_v47, %v793_v40  ;;  %v804_v53 = vrot.slane %v4240_v23, 5  ;;  %v2991_v52 = vcombine.low %v4234_v14, %v4240_v23  ;;  %v4488_v58 = vsel %vm4263_vm7, %v3006_v43, %v797_v15  ;;  %v747_v14 = vld [vmem:[%s4069_s6] sm:$0xe]  ;;  %v4516_v31 = vld [vmem:[%s4069_s6 + $0x1c] sm:$0xf] }
  0x6d   : > { %3448 = vmatpush3.bf16.msra.mxu1 %v881_v13  ;;  %3435 = vmatprep.mubr.msk.bf16.mxu1 %vm457_vm3, %v2989_v9  ;;  %v3014_v29 = vcombine.low %v4469_v46, %v4478_v50  ;;  %v799_v11 = vrot.slane %v797_v15, 4  ;;  %v776_v61 = vrot.slane %v4075_v7, 5  ;;  %v3008_v10 = vrot.slane %v752_v19, 9  ;;  %v753_v1 = vld [vmem:[%s4069_s6 + $0x48] sm:$0xe] }
  0x6e   : > { %3706 = vmatprep.subr.msk.bf16.mxu1 %vm482_vm0, %v4443_v6  ;;  %v4494_v2 = vsel %vm4263_vm7, %v3007_v38, %v804_v53  ;;  %v806_v39 = vrot.slane %v804_v53, 4  ;;  %v779_v41 = vrot.slane %v4078_v8, 5  ;;  %v3003_v36 = vrot.slane %v747_v14, 9  ;;  %v4542_v38 = vld [vmem:[%s5014_s1 + $0x10] sm:$0x3] }
  0x6f   : > { %v4500_v23 = vsel %vm4263_vm7, %v799_v11, %v800_v48  ;;  %v778_v44 = vrot.slane %v776_v61, 4  ;;  %v811_v20 = vrot.slane %v4268_v4, 5  ;;  %v814_v21 = vrot.slane %v4271_v18, 5  ;;  %v4563_v14 = vld [vmem:[%s4069_s6 + $0x28] sm:$0xf] }
  0x70   : > { %v4509_v9 = vsel %vm4263_vm7, %v806_v39, %v807_v63  ;;  %v2992_v22 = vcombine.low %v4257_v56, %v4268_v4  ;;  %v2055_v24 = vshrl.u32 %v3168_v26, 16  ;;  %v2058_v8 = vshll.u32 %v3168_v26, 16  ;;  %v3802_v4 = vld [vmem:[%s4069_s6 + $0x30] sm:$0xff]   ;;  %v4665_v46 = vld [vmem:[%s4069_s6 + $0x44] sm:$0x1] }
  0x71   : > { %v2064_v40 = vshll.u32 %v4516_v31, 16  ;;  %v2068_v43 = vshrl.u32 %v4516_v31, 16  ;;  %v4528_v47 = vsel %vm4263_vm7, %v3008_v10, %v811_v20  ;;  %v2297_v18 = vsel %vm482_vm0, %v4331_v34, 0  ;;  %v3186_v7 = vld [vmem:[%s4069_s6 + $0x60] sm:$0xf] }
  0x72   : > { %3516 = vmatmul.mubr.msk.bf16.gmra.mrb[12].mxu0 %vm457_vm3, %v3126_v49  ;;  %v813_v49 = vrot.slane %v811_v20, 4  ;;  %v2993_v56 = vcombine.low %v4282_v30, %v4298_v62  ;;  %v777_v15 = vsel %vm4263_vm7, %v3003_v36, %v776_v61  ;;  %v780_v48 = vsel %vm4263_vm7, %v778_v44, %v779_v41  ;;  %v4550_v30 = vld [vmem:[%s4069_s6 + $0x20] sm:$0x1]  ;;  %v3171_v61 = vld [vmem:[%s4069_s6 + $0x24] sm:$0xf] }
  0x73   : > { %3521 = vmatprep.mubr.msk.bf16.mxu0 %vm457_vm3, %v3798_v16  ;;  %v3009_v34 = vrot.slane %v753_v1, 9  ;;  %v2057_v16 = vrot.slane %v2055_v24, 4  ;;  %v2060_v53 = vrot.slane %v2058_v8, 5  ;;  %v4556_v11 = vrot.slane %v2064_v40, 5  ;;  %v754_v44 = vld [vmem:[%s4069_s6 + $0x54] sm:$0xe] }
  0x74   : > { %3436 = vmatmul.mubr.msk.bf16.gmra.mrb[4].mxu1 %vm457_vm3, %v2990_v51  ;;  %v4546_v51 = vsel %vm4263_vm7, %v813_v49, %v814_v21  ;;  %v2070_v19 = vrot.slane %v2068_v43, 4  ;;  %v821_v39 = vrot.slane %v4302_v55, 5  ;;  %v2994_v10 = vcombine.low %v4320_v28, %v4336_v37  ;;  %v3174_v55 = vld [vmem:[%s4069_s6 + $0x30] sm:$0xf]  ;;  %v3804_v20 = vld [vmem:[%s4069_s6 + $0x3c] sm:$0xff]   ;;  %v3805_v1 = vld [vmem:[%s4069_s6 + $0x48] sm:$0xff]  }
  0x75   : > { %3439 = vmatprep.mubr.msk.bf16.mxu1 %vm457_vm3, %v2991_v52  ;;  %v818_v52 = vrot.slane %v4298_v62, 5  ;;  %v3012_v41 = vcombine.low %v777_v15, %v780_v48  ;;  %v2074_v36 = vshll.u32 %v4550_v30, 16  ;;  %v2061_v21 = vor.u32 %v2060_v53, %v2057_v16  ;;  %v4582_v8 = vld [vmem:[%s4069_s6 + $0x34] sm:$0xf] }
  0x76   : > { %v2071_v28 = vor.u32 %v2070_v19, %v4556_v11  ;;  %v2088_v40 = vshll.u32 %v4563_v14, 16  ;;  %v2092_v43 = vshrl.u32 %v4563_v14, 16  ;;  %v825_v15 = vrot.slane %v4336_v37, 5 }
  0x77   : > { %v4567_v62 = vsel %vm4263_vm7, %v3009_v34, %v818_v52  ;;  %v820_v26 = vrot.slane %v818_v52, 4  ;;  %v2112_v48 = vshll.u32 %v4582_v8, 16  ;;  %v2116_v34 = vshrl.u32 %v4582_v8, 16 }
  0x78   : > { %v828_v16 = vrot.slane %v4345_v54, 5  ;;  %v2062_v53 = vrot.slane %v2061_v21, 4  ;;  %v2076_v52 = vrot.slane %v2074_v36, 5  ;;  %v2072_v37 = vrot.slane %v2071_v28, 4  ;;  %v4605_v36 = vld [vmem:[%s4069_s6 + $0x2c] sm:$0x1] }
  0x79   : > { %v4579_v24 = vsel %vm4263_vm7, %v820_v26, %v821_v39  ;;  %v4601_v26 = vrot.slane %v2088_v40, 5  ;;  %v4612_v21 = vld [vmem:[%s4069_s6 + $0x38] sm:$0x1]  ;;  %v1080_v28 = vsel %vm482_vm0, %v4443_v6, 0 }
  0x7a   : > { %3522 = vmatmul.mubr.msk.bf16.vlgmr.msra.gmra.mrb[0].mxu0 %vm457_vm3, %v3800_v57  ;;  %v2082_v57 = vshll.u32 %v3171_v61, 16  ;;  %v3806_v40 = vld [vmem:[%s4069_s6 + $0x54] sm:$0xff]  }
  0x7b   : > { %3538 = vmatpush3.bf16.msra.mxu0 %v2297_v18  ;;  %3525 = vmatprep.mubr.msk.bf16.mxu0 %vm457_vm3, %v3802_v4  ;;  %v2103_v18 = vshrl.u32 %v3174_v55, 16  ;;  %v3010_v4 = vrot.slane %v754_v44, 9 }
  0x7c   : > { %3440 = vmatmul.mubr.msk.bf16.gmra.mrb[8].mxu1 %vm457_vm3, %v2992_v22  ;;  %3712 = vmatprep.subr.msk.bf16.mxu0 %vm482_vm0, %v4542_v38  ;;  %v2079_v22 = vshrl.u32 %v3171_v61, 16  ;;  %v827_v61 = vrot.slane %v825_v15, 4  ;;  %v2084_v54 = vrot.slane %v2082_v57, 5  ;;  %v2118_v57 = vrot.slane %v2116_v34, 4  ;;  %v3180_v34 = vld [vmem:[%s4069_s6 + $0x48] sm:$0xf] }
  0x7d   : > { %3443 = vmatprep.mubr.msk.bf16.mxu1 %vm457_vm3, %v2993_v56  ;;  %v2106_v56 = vshll.u32 %v3174_v55, 16  ;;  %v4597_v19 = vsel %vm4263_vm7, %v3010_v4, %v825_v15  ;;  %v2094_v55 = vrot.slane %v2092_v43, 4  ;;  %v2105_v44 = vrot.slane %v2103_v18, 4  ;;  %v4623_v43 = vld [vmem:[%s4069_s6 + $0x40] sm:$0xf] }
  0x7e   : > { %v2081_v39 = vrot.slane %v2079_v22, 4  ;;  %v4614_v22 = vrot.slane %v2112_v48, 5  ;;  %v3807_v18 = vld [vmem:[%s4069_s6 + $0x60] sm:$0xff]   ;;  %v2077_v4 = vsel %vm4108_vm4, %v2072_v37, %v2076_v52  ;;  %v2098_v48 = vshll.u32 %v4605_v36, 16 }
  0x7f   : > { %v2151_v52 = vshrl.u32 %v3180_v34, 16  ;;  %v2154_v37 = vshll.u32 %v3180_v34, 16 }
  0x80   : > { %v2085_v15 = vor.u32 %v2084_v54, %v2081_v39  ;;  %v2119_v63 = vor.u32 %v2118_v57, %v4614_v22  ;;  %v3183_v57 = vld [vmem:[%s4069_s6 + $0x54] sm:$0xf] }
  0x81   : > { %v2153_v50 = vrot.slane %v2151_v52, 4  ;;  %v2178_v34 = vshll.u32 %v3183_v57, 16 }
  0x82   : > { %3526 = vmatmul.mubr.msk.bf16.gmra.mrb[4].mxu0 %vm457_vm3, %v3804_v20  ;;  %v2108_v20 = vrot.slane %v2106_v56, 5  ;;  %v2067_v56 = vsel %vm4108_vm4, %v2062_v53, %v4556_v11  ;;  %v2136_v11 = vshll.u32 %v4623_v43, 16  ;;  %v2140_v53 = vshrl.u32 %v4623_v43, 16 }
  0x83   : > { %3529 = vmatprep.mubr.msk.bf16.mxu0 %vm457_vm3, %v3805_v1  ;;  %v2122_v1 = vshll.u32 %v4612_v21, 16  ;;  %v3193_v54 = vcombine.low %v2067_v56, %v2077_v4  ;;  %v2120_v56 = vrot.slane %v2119_v63, 4  ;;  %v4670_v63 = vld [vmem:[%s4069_s6 + $0x50] sm:$0x1] }
  0x84   : > { %3444 = vmatmul.mubr.msk.bf16.gmra.mrb[12].mxu1 %vm457_vm3, %v2994_v10  ;;  %v4609_v10 = vsel %vm4263_vm7, %v827_v61, %v828_v16  ;;  %v4634_v16 = vld [vmem:[%s4069_s6 + $0x4c] sm:$0xf]  ;;  %v2095_v61 = vor.u32 %v2094_v55, %v4601_v26  ;;  %v2109_v6 = vor.u32 %v2108_v20, %v2105_v44  ;;  %v2086_v55 = vrot.slane %v2085_v15, 4 }
  0x85   : > { %3449 = vmatprep.mubr.msk.bf16.mxu1 %vm457_vm3, %v3012_v41  ;;  %v3177_v41 = vld [vmem:[%s4069_s6 + $0x3c] sm:$0xf]  ;;  %v2160_v39 = vshll.u32 %v4634_v16, 16  ;;  %v2100_v44 = vrot.slane %v2098_v48, 5  ;;  %v2164_v20 = vshrl.u32 %v4634_v16, 16  ;;  %v2124_v33 = vrot.slane %v2122_v1, 5 }
  0x86   : > { %v2127_v49 = vshrl.u32 %v3177_v41, 16  ;;  %v2130_v13 = vshll.u32 %v3177_v41, 16  ;;  %v2096_v41 = vrot.slane %v2095_v61, 4  ;;  %v4658_v15 = vrot.slane %v2136_v11, 5 }
  0x87   : > { %v2142_v48 = vrot.slane %v2140_v53, 4  ;;  %v2175_v1 = vshrl.u32 %v3183_v57, 16  ;;  %v1349_v11 = vshll.u32 %v4384_v59, 16  ;;  %v2091_v53 = vsel %vm4108_vm4, %v2086_v55, %v4601_v26 }
  0x88   : > { %v2129_v25 = vrot.slane %v2127_v49, 4  ;;  %v2132_v4 = vrot.slane %v2130_v13, 5  ;;  %v4667_v49 = vrot.slane %v2160_v39, 5  ;;  %v2166_v13 = vrot.slane %v2164_v20, 4 }
  0x89   : > { %v2101_v52 = vsel %vm4108_vm4, %v2096_v41, %v2100_v44  ;;  %v2143_v57 = vor.u32 %v2142_v48, %v4658_v15  ;;  %v2125_v26 = vsel %vm4108_vm4, %v2120_v56, %v2124_v33  ;;  %v2177_v44 = vrot.slane %v2175_v1, 4  ;;  %v4708_v56 = vld [vmem:[%s4069_s6 + $0x5c] sm:$0x1] }
  0x8a   : > { %3530 = vmatmul.mubr.msk.bf16.gmra.mrb[8].mxu0 %vm457_vm3, %v3806_v40  ;;  %v2110_v40 = vrot.slane %v2109_v6, 4  ;;  %v2133_v20 = vor.u32 %v2132_v4, %v2129_v25  ;;  %v2167_v41 = vor.u32 %v2166_v13, %v4667_v49  ;;  %v5033_v33 = vcombine.low %v4494_v2, %v4509_v9 }
  0x8b   : > { %3533 = vmatprep.mubr.msk.bf16.mxu0 %vm457_vm3, %v3807_v18  ;;  %v3808_v18 = vld [vmem:[%s4069_s6 + $0x6c] sm:$0xff]   ;;  %v2199_v4 = vshrl.u32 %v3186_v7, 16  ;;  %v1353_v48 = vshrl.u32 %v4384_v59, 16  ;;  %v3194_v13 = vcombine.low %v2091_v53, %v2101_v52 }
  0x8c   : > { %3450 = vmatmul.mubr.msk.bf16.vlgmr.msra.gmra.mrb[0].mxu1 %vm457_vm3, %v3013_v27  ;;  %v4655_v27 = vld [vmem:[%s4069_s6 + $0x58] sm:$0xf]  ;;  %v2115_v39 = vsel %vm4108_vm4, %v2110_v40, %v4614_v22  ;;  %v5032_v22 = vcombine.low %v4488_v58, %v4500_v23  ;;  %v2180_v40 = vrot.slane %v2178_v34, 5  ;;  %v2202_v58 = vshll.u32 %v3186_v7, 16 }
  0x8d   : > { %3466 = vmatpush3.bf16.msra.mxu1 %v1080_v28  ;;  %3453 = vmatprep.mubr.msk.bf16.mxu1 %vm457_vm3, %v3014_v29  ;;  %v3817_v28 = vld [vmem:[%s5014_s1 + $0x8] sm:$0x3]  ;;  %v2156_v29 = vrot.slane %v2154_v37, 5  ;;  %v2184_v61 = vshll.u32 %v4655_v27, 16  ;;  %v2188_v6 = vshrl.u32 %v4655_v27, 16  ;;  %v2551_v37 = vsel %vm482_vm0, %v4542_v38, 0 }
  0x8e   : > { %3708 = vmatprep.subr.msk.bf16.mxu1 %vm482_vm0, %v3817_v28  ;;  %v2146_v28 = vshll.u32 %v4665_v46, 16  ;;  %v2170_v38 = vshll.u32 %v4670_v63, 16  ;;  %v2208_v23 = vshll.u32 %v4689_v60, 16  ;;  %v3195_v34 = vcombine.low %v2115_v39, %v2125_v26 }
  0x8f   : > { %v2157_v55 = vor.u32 %v2156_v29, %v2153_v50  ;;  %v4701_v25 = vrot.slane %v2184_v61, 5  ;;  %v2134_v50 = vrot.slane %v2133_v20, 4  ;;  %v2144_v29 = vrot.slane %v2143_v57, 4 }
  0x90   : > { %v2148_v1 = vrot.slane %v2146_v28, 5  ;;  %v2172_v9 = vrot.slane %v2170_v38, 5  ;;  %v2168_v61 = vrot.slane %v2167_v41, 4  ;;  %v2194_v7 = vshll.u32 %v4708_v56, 16  ;;  %v4729_v28 = vld [vmem:[%s4069_s6 + $0x68] sm:$0x1] }
  0x91   : > { %v2158_v2 = vrot.slane %v2157_v55, 4  ;;  %v2201_v35 = vrot.slane %v2199_v4, 4  ;;  %v4719_v59 = vrot.slane %v2208_v23, 5  ;;  %v4721_v57 = vrot.slane %v1349_v11, 5 }
  0x92   : > { %3534 = vmatmul.mubr.msk.bf16.gmra.mrb[12].mxu0 %vm457_vm3, %v3808_v18  ;;  %v2190_v18 = vrot.slane %v2188_v6, 4  ;;  %v2181_v6 = vor.u32 %v2180_v40, %v2177_v44  ;;  %v1355_v53 = vrot.slane %v1353_v48, 4  ;;  %v2139_v52 = vsel %vm4108_vm4, %v2134_v50, %v4658_v15 }
  0x93   : > { %3539 = vmatprep.mubr.msk.bf16.mxu0 %vm457_vm3, %v3193_v54  ;;  %v2212_v54 = vshrl.u32 %v4689_v60, 16  ;;  %v2204_v60 = vrot.slane %v2202_v58, 5  ;;  %v2149_v39 = vsel %vm4108_vm4, %v2144_v29, %v2148_v1  ;;  %v2232_v38 = vshll.u32 %v4717_v12, 16  ;;  %v3809_v1 = vld [vmem:[%s4069_s6 + $0xc] sm:$0xff]  }
  0x94   : > { %3454 = vmatmul.mubr.msk.bf16.gmra.mrb[4].mxu1 %vm457_vm3, %v5032_v22  ;;  %v2191_v22 = vor.u32 %v2190_v18, %v4701_v25  ;;  %v2236_v44 = vshrl.u32 %v4717_v12, 16  ;;  %v5034_v11 = vcombine.low %v4528_v47, %v4546_v51  ;;  %v2163_v15 = vsel %vm4108_vm4, %v2158_v2, %v4667_v49 }
  0x95   : > { %3457 = vmatprep.mubr.msk.bf16.mxu1 %vm457_vm3, %v5033_v33  ;;  %v3189_v33 = vld [vmem:[%s4069_s6 + $0x6c] sm:$0xf]  ;;  %v2214_v20 = vrot.slane %v2212_v54, 4  ;;  %v2173_v41 = vsel %vm4108_vm4, %v2168_v61, %v2172_v9  ;;  %v2182_v40 = vrot.slane %v2181_v6, 4  ;;  %v2196_v18 = vrot.slane %v2194_v7, 5 }
  0x96   : > { %v2223_v26 = vshrl.u32 %v3189_v33, 16  ;;  %v2226_v55 = vshll.u32 %v3189_v33, 16  ;;  %v5035_v4 = vcombine.low %v4567_v62, %v4579_v24  ;;  %v2192_v47 = vrot.slane %v2191_v22, 4  ;;  %v3076_v22 = vld [vmem:[%s4069_s6 + $0x48] sm:$0xf] }
  0x97   : > { %v2205_v51 = vor.u32 %v2204_v60, %v2201_v35  ;;  %v2218_v49 = vshll.u32 %v4729_v28, 16  ;;  %v1356_v58 = vor.u32 %v1355_v53, %v4721_v57  ;;  %v1359_v23 = vshll.u32 %v4387_v0, 16  ;;  %v4758_v60 = vld [vmem:[%s4069_s6 + $0x74] sm:$0x1] }
  0x98   : > { %v3196_v54 = vcombine.low %v2139_v52, %v2149_v39  ;;  %v2225_v48 = vrot.slane %v2223_v26, 4  ;;  %v2228_v62 = vrot.slane %v2226_v55, 5  ;;  %v4752_v24 = vrot.slane %v2232_v38, 5 }
  0x99   : > { %v2238_v50 = vrot.slane %v2236_v44, 4  ;;  %v3197_v29 = vcombine.low %v2163_v15, %v2173_v41  ;;  %v2187_v35 = vsel %vm4108_vm4, %v2182_v40, %v4701_v25  ;;  %v2206_v0 = vrot.slane %v2205_v51, 4  ;;  %v3811_v51 = vld [vmem:[%s4069_s6 + $0x24] sm:$0xff]  }
  0x9a   : > { %3540 = vmatmul.mubr.msk.bf16.vlgmr.msra.gmra.mrb[0].mxu0 %vm457_vm3, %v3194_v13  ;;  %v2197_v13 = vsel %vm4108_vm4, %v2192_v47, %v2196_v18  ;;  %v2220_v2 = vrot.slane %v2218_v49, 5  ;;  %v1357_v9 = vrot.slane %v1356_v58, 4  ;;  %v1361_v61 = vrot.slane %v1359_v23, 5 }
  0x9b   : > { %3556 = vmatpush3.bf16.msra.mxu0 %v2551_v37  ;;  %3543 = vmatprep.mubr.msk.bf16.mxu0 %vm457_vm3, %v3195_v34  ;;  %v2215_v37 = vor.u32 %v2214_v20, %v4719_v59  ;;  %v2446_v6 = vrot.slane %v4516_v31, 5  ;;  %v2229_v7 = vor.u32 %v2228_v62, %v2225_v48  ;;  %v2239_v33 = vor.u32 %v2238_v50, %v4752_v24  ;;  %v3209_v20 = vld [vmem:[%s4069_s6 + $0x18] sm:$0xe]  ;;  %v3211_v62 = vld [vmem:[%s4069_s6 + $0x30] sm:$0xe] }
  0x9c   : > { %3458 = vmatmul.mubr.msk.bf16.gmra.mrb[8].mxu1 %vm457_vm3, %v5034_v11  ;;  %v2242_v25 = vshll.u32 %v4758_v60, 16  ;;  %v5036_v53 = vcombine.low %v4597_v19, %v4609_v10  ;;  %v3198_v52 = vcombine.low %v2187_v35, %v2197_v13  ;;  %v2211_v31 = vsel %vm4108_vm4, %v2206_v0, %v4719_v59  ;;  %v3810_v59 = vld [vmem:[%s4069_s6 + $0x18] sm:$0xff]  }
  0x9d   : > { %3461 = vmatprep.mubr.msk.bf16.mxu1 %vm457_vm3, %v5035_v4  ;;  %v2216_v34 = vrot.slane %v2215_v37, 4  ;;  %v1340_v26 = vshrl.u32 %v3076_v22, 16  ;;  %v1343_v55 = vshll.u32 %v3076_v22, 16  ;;  %v3217_v19 = vrot.slane %v3209_v20, 9  ;;  %v3073_v4 = vld [vmem:[%s4069_s6 + $0x3c] sm:$0xf] }
  0x9e   : > { %v2448_v10 = vrot.slane %v2446_v6, 4  ;;  %v2449_v38 = vrot.slane %v4550_v30, 5  ;;  %v1362_v44 = vsel %vm4108_vm4, %v1357_v9, %v1361_v61  ;;  %v2230_v11 = vrot.slane %v2229_v7, 4  ;;  %v3210_v30 = vld [vmem:[%s4069_s6 + $0x24] sm:$0xe]  ;;  %v3812_v22 = vld [vmem:[%s4069_s6 + $0x30] sm:$0xff]  }
  0x9f   : > { %v2221_v39 = vsel %vm4108_vm4, %v2216_v34, %v2220_v2  ;;  %v2240_v15 = vrot.slane %v2239_v33, 4  ;;  %v2244_v41 = vrot.slane %v2242_v25, 5  ;;  %v1342_v40 = vrot.slane %v1340_v26, 4  ;;  %v3813_v20 = vld [vmem:[%s4069_s6 + $0x3c] sm:$0xff]   ;;  %v3079_v26 = vld [vmem:[%s4069_s6 + $0x54] sm:$0xf] }
  0xa0   : > { %v3199_v18 = vcombine.low %v2211_v31, %v2221_v39  ;;  %v1345_v47 = vrot.slane %v1343_v55, 5  ;;  %v2447_v37 = vsel %vm4263_vm7, %v3217_v19, %v2446_v6  ;;  %v2450_v49 = vsel %vm4263_vm7, %v2448_v10, %v2449_v38  ;;  %v3213_v38 = vld [vmem:[%s4069_s6 + $0x48] sm:$0xe] }
  0xa1   : > { %v2453_v58 = vrot.slane %v4563_v14, 5  ;;  %v2245_v48 = vsel %vm4108_vm4, %v2240_v15, %v2244_v41  ;;  %v2460_v50 = vrot.slane %v4582_v8, 5  ;;  %v1319_v35 = vshll.u32 %v3073_v4, 16 }
  0xa2   : > { %3544 = vmatmul.mubr.msk.bf16.gmra.mrb[4].mxu0 %vm457_vm3, %v3196_v54  ;;  %v1346_v23 = vor.u32 %v1345_v47, %v1342_v40  ;;  %v2235_v54 = vsel %vm4108_vm4, %v2230_v11, %v4752_v24  ;;  %v1325_v14 = vshll.u32 %v4366_v42, 16  ;;  %v3218_v24 = vrot.slane %v3210_v30, 9 }
  0xa3   : > { %3547 = vmatprep.mubr.msk.bf16.mxu0 %vm457_vm3, %v3197_v29  ;;  %v1316_v29 = vshrl.u32 %v3073_v4, 16  ;;  %v2456_v8 = vrot.slane %v4605_v36, 5  ;;  %v3226_v0 = vcombine.low %v2447_v37, %v2450_v49  ;;  %v2455_v34 = vrot.slane %v2453_v58, 4  ;;  %v3814_v37 = vld [vmem:[%s4069_s6 + $0x48] sm:$0xff]  }
  0xa4   : > { %3462 = vmatmul.mubr.msk.bf16.gmra.mrb[12].mxu1 %vm457_vm3, %v5036_v53  ;;  %v1347_v13 = vrot.slane %v1346_v23, 4  ;;  %v3219_v2 = vrot.slane %v3211_v62, 9  ;;  %v3200_v61 = vcombine.low %v2235_v54, %v2245_v48  ;;  %v2462_v6 = vrot.slane %v2460_v50, 4  ;;  %v3815_v23 = vld [vmem:[%s4069_s6 + $0x54] sm:$0xff]  }
  0xa5   : > { %3467 = vmatprep.mubr.msk.bf16.mxu1 %vm457_vm3, %v3809_v1  ;;  %v1329_v1 = vshrl.u32 %v4366_v42, 16  ;;  %v2463_v42 = vrot.slane %v4612_v21, 5  ;;  %v1318_v7 = vrot.slane %v1316_v29, 4  ;;  %v1321_v33 = vrot.slane %v1319_v35, 5 }
  0xa6   : > { %v1352_v9 = vsel %vm4108_vm4, %v1347_v13, %v4721_v57  ;;  %v4814_v25 = vrot.slane %v1325_v14, 5  ;;  %v2454_v53 = vsel %vm4263_vm7, %v3218_v24, %v2453_v58  ;;  %v2457_v57 = vsel %vm4263_vm7, %v2455_v34, %v2456_v8  ;;  %v3214_v24 = vld [vmem:[%s4069_s6 + $0x54] sm:$0xe]  ;;  %v5037_v8 = vld [vmem:[#allocation11_spill] sm:$0xff] }
  0xa7   : > { %v1331_v36 = vrot.slane %v1329_v1, 4  ;;  %v2461_v21 = vsel %vm4263_vm7, %v3219_v2, %v2460_v50  ;;  %v2467_v31 = vrot.slane %v4623_v43, 5  ;;  %v1335_v39 = vshll.u32 %v4369_v45, 16  ;;  %v3082_v50 = vld [vmem:[%s4069_s6 + $0x60] sm:$0xf] }
  0xa8   : > { %v2464_v55 = vsel %vm4263_vm7, %v2462_v6, %v2463_v42  ;;  %v1322_v19 = vor.u32 %v1321_v33, %v1318_v7  ;;  %v3227_v43 = vcombine.low %v2454_v53, %v2457_v57  ;;  %v2470_v11 = vrot.slane %v4665_v46, 5  ;;  %v5039_v33 = vld [vmem:[#allocation8_spill] sm:$0xff] }
  0xa9   : > { %v1332_v10 = vor.u32 %v1331_v36, %v4814_v25  ;;  %v1364_v15 = vshrl.u32 %v3079_v26, 16  ;;  %v1367_v41 = vshll.u32 %v3079_v26, 16  ;;  %v1373_v40 = vshll.u32 %v4395_v17, 16 }
  0xaa   : > { %3548 = vmatmul.mubr.msk.bf16.gmra.mrb[8].mxu0 %vm457_vm3, %v3198_v52  ;;  %v3212_v52 = vld [vmem:[%s4069_s6 + $0x3c] sm:$0xe]  ;;  %v2469_v4 = vrot.slane %v2467_v31, 4  ;;  %v1337_v47 = vrot.slane %v1335_v39, 5  ;;  %v2477_v58 = vrot.slane %v4670_v63, 5  ;;  %v2481_v63 = vrot.slane %v4655_v27, 5 }
  0xab   : > { %3551 = vmatprep.mubr.msk.bf16.mxu0 %vm457_vm3, %v3199_v18  ;;  %v3220_v45 = vrot.slane %v3212_v52, 9  ;;  %v3228_v18 = vcombine.low %v2461_v21, %v2464_v55  ;;  %v1333_v49 = vrot.slane %v1332_v10, 4  ;;  %v1366_v46 = vrot.slane %v1364_v15, 4  ;;  %v3215_v27 = vld [vmem:[%s4069_s6 + $0x60] sm:$0xe] }
  0xac   : > { %3468 = vmatmul.mubr.msk.bf16.vlgmr.msra.gmra.mrb[0].mxu1 %vm457_vm3, %v3810_v59  ;;  %v1377_v59 = vshrl.u32 %v4395_v17, 16  ;;  %v1369_v54 = vrot.slane %v1367_v41, 5  ;;  %v1375_v48 = vrot.slane %v1373_v40, 5  ;;  %v2471_v29 = vsel %vm4263_vm7, %v2469_v4, %v2470_v11  ;;  %v3816_v52 = vld [vmem:[%s4069_s6 + $0x60] sm:$0xff]  }
  0xad   : > { %3574 = vmatpush3.bf16.msra.mxu1 %v4052_v3  ;;  %3471 = vmatprep.mubr.msk.bf16.mxu1 %vm457_vm3, %v3811_v51  ;;  %v4811_v3 = vcombine.low %v1352_v9, %v1362_v44  ;;  %v2474_v44 = vrot.slane %v4634_v16, 5  ;;  %v3221_v51 = vrot.slane %v3213_v38, 9  ;;  %v1323_v16 = vrot.slane %v1322_v19, 4  ;;  %v5038_v9 = vld [vmem:[#allocation9_spill] sm:$0xff] }
  0xae   : > { %v1379_v62 = vrot.slane %v1377_v59, 4  ;;  %v2468_v17 = vsel %vm4263_vm7, %v3220_v45, %v2467_v31  ;;  %v1338_v1 = vsel %vm4108_vm4, %v1333_v49, %v1337_v47  ;;  %v1388_v34 = vshrl.u32 %v3082_v50, 16  ;;  %v3216_v47 = vld [vmem:[%s4069_s6 + $0x6c] sm:$0xe]  ;;  %s2967_s6 = sshll.u32 %s4906_s5, 6 }
  0xaf   : > { %v2476_v30 = vrot.slane %v2474_v44, 4  ;;  %v2475_v35 = vsel %vm4263_vm7, %v3221_v51, %v2474_v44  ;;  %v1328_v14 = vsel %vm4108_vm4, %v1323_v16, %v4814_v25  ;;  %v1391_v2 = vshll.u32 %v3082_v50, 16  ;;  %s4909_s7 = scalar_lea.vmem [#allocation2], %s2967_s6  ;;  %s3822_s6 = sshll.u32 %s3946_s4, 4  ;;  %s3823_s6 = int_to_ptr.vmem [resolvable:$false] %s3822_s6 }
  0xb0   : > { %v1401_v6 = vshrl.u32 %v5038_v9, 16  ;;  %v3229_v42 = vcombine.low %v2468_v17, %v2471_v29  ;;  %v1380_v7 = vor.u32 %v1379_v62, %v1375_v48  ;;  %v1383_v25 = vshll.u32 %v5039_v33, 16  ;;  %s2828_s20 = sshll.u32 %s4909_s7, 4  ;;  %s3824_s8 = scalar_lea.vmem %s3823_s6, 2048  ;;  %s4925_s20 = int_to_ptr.vmem [resolvable:$true] %s2828_s20 }
  0xb1   : > { %v2478_v13 = vsel %vm4263_vm7, %v2476_v30, %v2477_v58  ;;  %v2483_v53 = vrot.slane %v2481_v63, 4  ;;  %v2484_v57 = vrot.slane %v4708_v56, 5  ;;  %v3090_v21 = vcombine.low %v1328_v14, %v1338_v1  ;;  %s3818_s29 = scalar_lea.vmem %s4925_s20, 1024  ;;  %p3825_p4 = scmp.lt.s32.totalorder %s4925_s20, %s3823_s6 }
  0xb2   : > { %3552 = vmatmul.mubr.msk.bf16.gmra.mrb[12].mxu0 %vm457_vm3, %v3200_v61  ;;  %v1397_v61 = vshll.u32 %v5038_v9, 16  ;;  %v3230_v36 = vcombine.low %v2475_v35, %v2478_v13  ;;  %v3223_v31 = vrot.slane %v3215_v27, 9  ;;  %v2491_v26 = vrot.slane %v4729_v28, 5  ;;  %p3819_p0 = scmp.ne.s32.totalorder %s4925_s20, %s3818_s29  ;;  %p3826_p5 = scmp.lt.s32.totalorder %s3824_s8, %s3818_s29 }
  0xb3   : > { %3557 = vmatprep.mubr.msk.bf16.mxu0 %vm457_vm3, %v3226_v0  ;;  %v2488_v0 = vrot.slane %v5037_v8, 5  ;;  %v1390_v55 = vrot.slane %v1388_v34, 4  ;;  %v1393_v19 = vrot.slane %v1391_v2, 5  ;;  %v1403_v38 = vrot.slane %v1401_v6, 4 }
  0xb4   : > { %3472 = vmatmul.mubr.msk.bf16.gmra.mrb[4].mxu1 %vm457_vm3, %v3812_v22  ;;  %v1370_v22 = vor.u32 %v1369_v54, %v1366_v46  ;;  %v1399_v10 = vrot.slane %v1397_v61, 5  ;;  %v1385_v45 = vrot.slane %v1383_v25, 5  ;;  %v2485_v28 = vsel %vm4263_vm7, %v2483_v53, %v2484_v57  ;;  %p3820_p1 = pnand %p3819_p0, %p4021_p3  ;;  %p3827_p6 = por %p3826_p5, %p3825_p4 }
  0xb5   : > { %3475 = vmatprep.mubr.msk.bf16.mxu1 %vm457_vm3, %v3813_v20  ;;  %v3222_v20 = vrot.slane %v3214_v24, 9  ;;  %v2490_v39 = vrot.slane %v2488_v0, 4  ;;  %v2489_v11 = vsel %vm4263_vm7, %v3223_v31, %v2488_v0  ;;  %v2495_v15 = vrot.slane %v4717_v12, 5 }
  0xb6   : > { %v1371_v44 = vrot.slane %v1370_v22, 4  ;;  %v1394_v40 = vor.u32 %v1393_v19, %v1390_v55  ;;  %v1404_v59 = vor.u32 %v1403_v38, %v1399_v10  ;;  %v3224_v30 = vrot.slane %v3216_v47, 9  ;;  %p3821_p2 = pneg %p3820_p1 }
  0xb7   : > { %v2482_v56 = vsel %vm4263_vm7, %v3222_v20, %v2481_v63  ;;  %v2492_v41 = vsel %vm4263_vm7, %v2490_v39, %v2491_v26  ;;  %v2497_v12 = vrot.slane %v2495_v15, 4  ;;  %v2498_v58 = vrot.slane %v4758_v60, 5 }
  0xb8   : > { %v1376_v51 = vsel %vm4108_vm4, %v1371_v44, %v1375_v48  ;;  %v3231_v16 = vcombine.low %v2482_v56, %v2485_v28  ;;  %v3232_v49 = vcombine.low %v2489_v11, %v2492_v41  ;;  %v1395_v46 = vrot.slane %v1394_v40, 4  ;;  %p3828_p7 = pnand %p3827_p6, %p3821_p2 }
  0xb9   : > { %v1405_v54 = vrot.slane %v1404_v59, 4  ;;  %v2496_v48 = vsel %vm4263_vm7, %v3224_v30, %v2495_v15  ;;  %v2499_v50 = vsel %vm4263_vm7, %v2497_v12, %v2498_v58 }
  0xba   : > { %3558 = vmatmul.mubr.msk.bf16.vlgmr.msra.gmra.mrb[0].mxu0 %vm457_vm3, %v3227_v43  ;;  %v1381_v43 = vrot.slane %v1380_v7, 4  ;;  %v1400_v60 = vsel %vm4108_vm4, %v1395_v46, %v1399_v10  ;;  %v3233_v29 = vcombine.low %v2496_v48, %v2499_v50 }
  0xbb   : > { %3561 = vmatprep.mubr.msk.bf16.mxu0 %vm457_vm3, %v3228_v18  ;;  %v5040_v18 = vld [vmem:[#allocation10_spill] sm:$0xff] }
  0xbc   : > { %3476 = vmatmul.mubr.msk.bf16.gmra.mrb[8].mxu1 %vm457_vm3, %v3814_v37  ;;  %v1407_v4 = vshll.u32 %v5040_v18, 16  ;;  %v1386_v37 = vsel %vm4108_vm4, %v1381_v43, %v1385_v45 }
  0xbd   : > { %3479 = vmatprep.mubr.msk.bf16.mxu1 %vm457_vm3, %v3815_v23  ;;  %v3092_v23 = vcombine.low %v1376_v51, %v1386_v37 }
  0xbe   : > { %v1409_v62 = vrot.slane %v1407_v4, 5 }
  0xc0   : > { %v1410_v17 = vsel %vm4108_vm4, %v1405_v54, %v1409_v62 }
  0xc1   : > { %v3093_v35 = vcombine.low %v1400_v60, %v1410_v17 }
  0xc2   : > { %3562 = vmatmul.mubr.msk.bf16.gmra.mrb[4].mxu0 %vm457_vm3, %v3229_v42 }
  0xc3   : > { %3565 = vmatprep.mubr.msk.bf16.mxu0 %vm457_vm3, %v3230_v36 }
  0xc4   : > { %3480 = vmatmul.mubr.msk.bf16.gmra.mrb[12].mxu1 %vm457_vm3, %v3816_v52 }
  0xc5   : > { %3493 = vmatprep.mubr.msk.bf16.mxu1 %vm457_vm3, %v3090_v21 }
  0xca   : > { %3566 = vmatmul.mubr.msk.bf16.gmra.mrb[8].mxu0 %vm457_vm3, %v3231_v16 }
  0xcb   : > { %3569 = vmatprep.mubr.msk.bf16.mxu0 %vm457_vm3, %v3232_v49 }
  0xcc   : > { %3494 = vmatmul.mubr.msk.bf16.vlgmr.msra.gmra.mrb[8].mxu1 %vm457_vm3, %v4811_v3 }
  0xcd   : > { %3497 = vmatprep.mubr.msk.bf16.mxu1 %vm457_vm3, %v3092_v23 }
  0xd2   : > { %3570 = vmatmul.mubr.msk.bf16.gmra.mrb[12].mxu0 %vm457_vm3, %v3233_v29 }
  0xd4   : > { %3498 = vmatmul.mubr.msk.bf16.gmra.mrb[12].mxu1 %vm457_vm3, %v3093_v35 }
 0x17f   : > { %v3469_v3 = vpop.f32.mrb[0].mxu1 }
 0x180   : > { %v1116_v63 = vpop.f32.mrb[1].mxu1 }
 0x181   : > { %v3470_v14 = vpop.f32.mrb[2].mxu1 }
 0x182   : > { %v1119_v5 = vpop.f32.mrb[3].mxu1 }
 0x187   : > { %v3473_v1 = vpop.f32.mrb[4].mxu1 }
 0x188   : > { %v1132_v13 = vpop.f32.mrb[5].mxu1 }
 0x189   : > { %v3474_v24 = vpop.f32.mrb[6].mxu1 }
 0x18a   : > { %v1135_v8 = vpop.f32.mrb[7].mxu1 }
 0x18d   : > { %v3559_v0 = vpop.f32.mrb[0].mxu0 }
 0x18e   : > { %v3575_v32 = vadd.f32 %v3559_v0, %v3469_v3  ;;  %v2587_v27 = vpop.f32.mrb[1].mxu0 }
 0x18f   : > { %v3576_v34 = vadd.f32 %v2587_v27, %v1116_v63  ;;  %v3560_v2 = vpop.f32.mrb[2].mxu0 }
 0x190   : > { %v3577_v9 = vadd.f32 %v3560_v2, %v3470_v14  ;;  %v2590_v61 = vpop.f32.mrb[3].mxu0  ;;  %v2689_v36 = vmul.f32 %v3575_v32, %v3575_v32 }
 0x191   : > { %v3578_v6 = vadd.f32 %v2590_v61, %v1119_v5  ;;  %v2687_v22 = vmul.f32 %v3576_v34, %v3576_v34 }
 0x192   : > { %v3291_v42 = vpack.c.bf16 %v3577_v9, %v3575_v32  ;;  %v2690_v31 = vmul.f32 %v3577_v9, %v3577_v9 }
 0x193   : > { %v2666_v7 = vadd.f32 %v3578_v6, %v3576_v34  ;;  %v2688_v33 = vmul.f32 %v3578_v6, %v3578_v6  ;;  %v3286_v25 = vpack.c.bf16 %v3578_v6, %v3576_v34 }
 0x194   : > { %3323 = vst [vmem:[%s4909_s7 + $0x8] sm:$0xff] %v3291_v42  }
 0x195   : > { %v2667_v20 = vadd.f32 %v3575_v32, %v2666_v7  ;;  %v2703_v53 = vadd.f32 %v2688_v33, %v2687_v22  ;;  %3287 = vst [vmem:[%s4909_s7] sm:$0xff] %v3286_v25   ;;  %v3563_v57 = vpop.f32.mrb[4].mxu0 }
 0x196   : > { %v3579_v52 = vadd.f32 %v3563_v57, %v3473_v1  ;;  %v2603_v21 = vpop.f32.mrb[5].mxu0 }
 0x197   : > { %v2704_v39 = vadd.f32 %v2703_v53, %v2689_v36  ;;  %v3580_v26 = vadd.f32 %v2603_v21, %v1132_v13  ;;  %v2668_v55 = vadd.f32 %v3577_v9, %v2667_v20  ;;  %v3564_v19 = vpop.f32.mrb[6].mxu0 }
 0x198   : > { %v3581_v10 = vadd.f32 %v3564_v19, %v3474_v24  ;;  %v2606_v38 = vpop.f32.mrb[7].mxu0  ;;  %v2693_v59 = vmul.f32 %v3579_v52, %v3579_v52 }
 0x199   : > { %v2669_v44 = vadd.f32 %v3580_v26, %v2668_v55  ;;  %v2691_v43 = vmul.f32 %v3580_v26, %v3580_v26  ;;  %v2705_v45 = vadd.f32 %v2704_v39, %v2690_v31  ;;  %v3582_v56 = vadd.f32 %v2606_v38, %v1135_v8 }
 0x19a   : > { %v3301_v28 = vpack.c.bf16 %v3581_v10, %v3579_v52  ;;  %v2694_v16 = vmul.f32 %v3581_v10, %v3581_v10 }
 0x19b   : > { %v2706_v11 = vadd.f32 %v2705_v45, %v2691_v43  ;;  %v2670_v15 = vadd.f32 %v3582_v56, %v2669_v44  ;;  %v2692_v41 = vmul.f32 %v3582_v56, %v3582_v56  ;;  %v3296_v40 = vpack.c.bf16 %v3582_v56, %v3580_v26 }
 0x19c   : > { %3325 = vst [vmem:[%s4909_s7 + $0x18] sm:$0xff] %v3301_v28  }
 0x19d   : > { %v2671_v18 = vadd.f32 %v3579_v52, %v2670_v15  ;;  %v2707_v4 = vadd.f32 %v2706_v11, %v2692_v41  ;;  %3324 = vst [vmem:[%s4909_s7 + $0x10] sm:$0xff] %v3296_v40   ;;  %v3567_v47 = vpop.f32.mrb[8].mxu0 }
 0x19e   : > { %v2619_v37 = vpop.f32.mrb[9].mxu0 }
 0x19f   : > { %v3495_v51 = vpop.f32.mrb[8].mxu1  ;;  %v2708_v49 = vadd.f32 %v2707_v4, %v2693_v59  ;;  %v2672_v58 = vadd.f32 %v3581_v10, %v2671_v18  ;;  %v3568_v23 = vpop.f32.mrb[10].mxu0 }
 0x1a0   : > { %v3583_v30 = vadd.f32 %v3567_v47, %v3495_v51  ;;  %v1530_v12 = vpop.f32.mrb[9].mxu1  ;;  %v2622_v62 = vpop.f32.mrb[11].mxu0 }
 0x1a1   : > { %v3584_v46 = vadd.f32 %v2619_v37, %v1530_v12  ;;  %v3496_v54 = vpop.f32.mrb[10].mxu1  ;;  %v2709_v48 = vadd.f32 %v2708_v49, %v2694_v16 }
 0x1a2   : > { %v3585_v50 = vadd.f32 %v3568_v23, %v3496_v54  ;;  %v1533_v60 = vpop.f32.mrb[11].mxu1  ;;  %v2697_v24 = vmul.f32 %v3583_v30, %v3583_v30 }
 0x1a3   : > { %v2673_v17 = vadd.f32 %v3584_v46, %v2672_v58  ;;  %v2695_v29 = vmul.f32 %v3584_v46, %v3584_v46  ;;  %v3586_v35 = vadd.f32 %v2622_v62, %v1533_v60 }
 0x1a4   : > { %v3311_v3 = vpack.c.bf16 %v3585_v50, %v3583_v30  ;;  %v2698_v61 = vmul.f32 %v3585_v50, %v3585_v50 }
 0x1a5   : > { %v2710_v63 = vadd.f32 %v2709_v48, %v2695_v29  ;;  %v2674_v14 = vadd.f32 %v3586_v35, %v2673_v17  ;;  %v2696_v5 = vmul.f32 %v3586_v35, %v3586_v35  ;;  %v3306_v1 = vpack.c.bf16 %v3586_v35, %v3584_v46  ;;  %v3571_v13 = vpop.f32.mrb[12].mxu0 }
 0x1a6   : > { %3327 = vst [vmem:[%s4909_s7 + $0x28] sm:$0xff] %v3311_v3   ;;  %v2635_v27 = vpop.f32.mrb[13].mxu0 }
 0x1a7   : > { %v2675_v8 = vadd.f32 %v3583_v30, %v2674_v14  ;;  %v2711_v0 = vadd.f32 %v2710_v63, %v2696_v5  ;;  %3326 = vst [vmem:[%s4909_s7 + $0x20] sm:$0xff] %v3306_v1   ;;  %v3499_v32 = vpop.f32.mrb[12].mxu1  ;;  %v3572_v9 = vpop.f32.mrb[14].mxu0 }
 0x1a8   : > { %v3587_v34 = vadd.f32 %v3571_v13, %v3499_v32  ;;  %v1546_v2 = vpop.f32.mrb[13].mxu1  ;;  %v2638_v33 = vpop.f32.mrb[15].mxu0 }
 0x1a9   : > { %v2712_v6 = vadd.f32 %v2711_v0, %v2697_v24  ;;  %v3588_v42 = vadd.f32 %v2635_v27, %v1546_v2  ;;  %v2676_v22 = vadd.f32 %v3585_v50, %v2675_v8  ;;  %v3500_v7 = vpop.f32.mrb[14].mxu1 }
 0x1aa   : > { %v3589_v25 = vadd.f32 %v3572_v9, %v3500_v7  ;;  %v1549_v36 = vpop.f32.mrb[15].mxu1  ;;  %v2701_v19 = vmul.f32 %v3587_v34, %v3587_v34 }
 0x1ab   : > { %v2677_v20 = vadd.f32 %v3588_v42, %v2676_v22  ;;  %v2699_v53 = vmul.f32 %v3588_v42, %v3588_v42  ;;  %v2713_v57 = vadd.f32 %v2712_v6, %v2698_v61  ;;  %v3590_v52 = vadd.f32 %v2638_v33, %v1549_v36 }
 0x1ac   : > { %v3321_v21 = vpack.c.bf16 %v3589_v25, %v3587_v34 }
 0x1ad   : > { %v2714_v31 = vadd.f32 %v2713_v57, %v2699_v53  ;;  %v2678_v39 = vadd.f32 %v3590_v52, %v2677_v20  ;;  %v2700_v26 = vmul.f32 %v3590_v52, %v3590_v52  ;;  %v3316_v55 = vpack.c.bf16 %v3590_v52, %v3588_v42 }
 0x1ae   : > { %3329 = vst [vmem:[%s4909_s7 + $0x38] sm:$0xff] %v3321_v21  }
 0x1af   : > { %v2679_v10 = vadd.f32 %v3587_v34, %v2678_v39  ;;  %v2715_v38 = vadd.f32 %v2714_v31, %v2700_v26  ;;  %3328 = vst [vmem:[%s4909_s7 + $0x30] sm:$0xff] %v3316_v55  }
 0x1b0   : > { %3831 = shalt.err (!%p3828_p7)
}
 0x1b1   : > { %s3832_s7 = scalar_lea.hbm %s4923_s27, 1024  ;;  %s3836_s11 = scalar_lea.hbm %s5015_s2, 4096 }
 0x1b2   : > { %p3833_p9 = scmp.ne.s32.totalorder %s4923_s27, %s3832_s7  ;;  %p3837_p12 = scmp.lt.u32.totalorder %s4923_s27, %s5015_s2 }
 0x1b3   : > { %p3838_p13 = scmp.lt.u32.totalorder %s3836_s11, %s3832_s7  ;;  %p3840_p1 = scmp.lt.u32.totalorder %s3832_s7, %s4923_s27 }
 0x1b4   : > { %p3834_p10 = pnand %p3833_p9, %p4021_p3 }
 0x1b5   : > { %p3839_p0 = por %p3838_p13, %p3837_p12 }
 0x1b6   : > { %p3835_p11 = pneg %p3834_p10 }
 0x1b7   : > { %p3841_p2 = por %p3840_p1, %p3839_p0 }
 0x1b9   : > { %p3842_p4 = pnand %p3841_p2, %p3835_p11 }
 0x1bb   : > { %3845 = shalt.err (!%p3842_p4)
}
 0x1bc   : > { %s3947_s29 = smov 64   ;;  %s3948_s4 = smov 4   ;;  %v2702_v44 = vmul.f32 %v3589_v25, %v3589_v25  ;;  %v2680_v43 = vadd.f32 %v3589_v25, %v2679_v10  ;;  %v2716_v45 = vadd.f32 %v2715_v38, %v2701_v19  ;;  %vm2724_vm8 = vcmask 1040384  }
 0x1bd   : > { %3715 = dma.vmem_to_hbm [thread:$0]  (%p4021_p3), %s4925_s20, 1024, %s4923_s27, %s2808_s28, %s3947_s29, %s3947_s29, %s3948_s4  }
 0x1be   : > { %v2681_v56 = vrot.slane %v2680_v43, 4  ;;  %v2717_v28 = vadd.f32 %v2716_v45, %v2702_v44  ;;  %s2968_s6 = sshll.u32 %s4906_s5, 1  ;;  %s3263_s8 = sshll.u32 %s3932_s16, 1 }
 0x1bf   : > { %s2842_s7 = sadd.s32 %s3928_s15, %s3263_s8  ;;  %s200_s27 = scalar_lea.vmem [#allocation4], %s2968_s6 }
 0x1c0   : > { %v2682_v11 = vadd.f32 %v2681_v56, %v2680_v43  ;;  %v2718_v15 = vrot.slane %v2717_v28, 4  ;;  %s3264_s20 = sshll.u32 %s2842_s7, 5  ;;  %s2846_s28 = sshll.u32 %s200_s27, 4  ;;  %s4961_s28 = int_to_ptr.vmem [resolvable:$true] %s2846_s28 }
 0x1c1   : > { %s4959_s11 = scalar_lea.hbm %s5016_s3, %s3264_s20  ;;  %s2813_s15 = scalar_lea.sflag [#allocation5], %s4906_s5 }
 0x1c2   : > { %v2683_v41 = vrot.slane %v2682_v11, 2  ;;  %v2719_v40 = vadd.f32 %v2718_v15, %v2717_v28  ;;  %s3846_s16 = scalar_lea.vmem %s4961_s28, 32  ;;  %s3949_s21 = smov [#allocation4]  }
 0x1c3   : > { %p3847_p5 = scmp.ne.s32.totalorder %s4961_s28, %s3846_s16  ;;  %s3850_s24 = sshll.u32 %s3949_s21, 4  ;;  %s3851_s24 = int_to_ptr.vmem [resolvable:$false] %s3850_s24 }
 0x1c4   : > { %v2684_v59 = vadd.f32 %v2683_v41, %v2682_v11  ;;  %v2720_v18 = vrot.slane %v2719_v40, 2  ;;  %s3852_s29 = scalar_lea.vmem %s3851_s24, 64  ;;  %p3853_p9 = scmp.lt.s32.totalorder %s4961_s28, %s3851_s24 }
 0x1c5   : > { %p3848_p6 = pnand %p3847_p5, %p4021_p3  ;;  %p3854_p10 = scmp.lt.s32.totalorder %s3852_s29, %s3846_s16 }
 0x1c6   : > { %v2685_v4 = vrot.slane %v2684_v59, 1  ;;  %v2721_v47 = vadd.f32 %v2720_v18, %v2719_v40 }
 0x1c7   : > { %p3849_p7 = pneg %p3848_p6  ;;  %p3855_p11 = por %p3854_p10, %p3853_p9 }
 0x1c8   : > { %v2722_v51 = vrot.slane %v2721_v47, 1  ;;  %v2686_v37 = vadd.f32 %v2685_v4, %v2684_v59 }
 0x1c9   : > { %p3856_p12 = pnand %p3855_p11, %p3849_p7 }
 0x1ca   : > { %v2723_v16 = vadd.f32 %v2722_v51, %v2721_v47 }
 0x1cc   : > { %v2725_v49 = vsel %vm2724_vm8, %v2686_v37, %v2723_v16 }
 0x1cd   : > { %2726 = vst [vmem:[%s200_s27] sm:$0x3] %v2725_v49 }
 0x1ce   : > { %3859 = shalt.err (!%p3856_p12)
}
 0x1cf   : > { %s3860_s5 = scalar_lea.hbm %s4959_s11, 32  ;;  %s3864_s8 = scalar_lea.hbm %s5016_s3, 128 }
 0x1d0   : > { %p3861_p13 = scmp.ne.s32.totalorder %s4959_s11, %s3860_s5  ;;  %p3865_p2 = scmp.lt.u32.totalorder %s4959_s11, %s5016_s3 }
 0x1d1   : > { %p3866_p4 = scmp.lt.u32.totalorder %s3864_s8, %s3860_s5  ;;  %p3868_p6 = scmp.lt.u32.totalorder %s3860_s5, %s4959_s11 }
 0x1d2   : > { %p3862_p0 = pnand %p3861_p13, %p4021_p3 }
 0x1d3   : > { %p3867_p5 = por %p3866_p4, %p3865_p2 }
 0x1d4   : > { %p3863_p1 = pneg %p3862_p0 }
 0x1d5   : > { %p3869_p7 = por %p3868_p6, %p3867_p5 }
 0x1d7   : > { %p3870_p9 = pnand %p3869_p7, %p3863_p1 }
 0x1d9   : > { %3873 = shalt.err (!%p3870_p9)
}
 0x1da   : > { %3716 = dma.vmem_to_hbm [thread:$0]  (%p4021_p3), %s4961_s28, 32, %s4959_s11, %s2813_s15  }
 0x1db PF: > { %p3726_p10 = scmp.ge.s32.totalorder %s3944_s19, 2  ;;  %s2858_s27 = sand.u32 1, %s3916_s12  }
 0x1dc   : > { %s2859_s9 = scalar_lea.sflag [#allocation3], %s2858_s27 }
 0x1dd   : > { %p3720_p11 = pnand %p3726_p10, %p4030_p8 }
 0x1df   : > { %3907 = dma.done.wait (!%p3720_p11), %s2859_s9, 1024  }
 0x1e0   : > { %3909 = vsyncadd (!%p3720_p11), %s2859_s9, 4294966272  ;;  %s2868_s10 = scalar_lea.sflag [#allocation5], %s2858_s27 }
 0x1e1   : > { %3911 = dma.done.wait (!%p3720_p11), %s2868_s10, 32  }
 0x1e2   : > { %3913 = vsyncadd (!%p3720_p11), %s2868_s10, 4294967264  ;;  %s20_s19 = sadd.s32 1, %s3944_s19   ;;  %s5041_s12 = smov %s3920_s13 }
 0x1e3   : > { %p17_p12 = scmp.ge.s32.totalorder %s20_s19, 6   ;;  %s5042_s13 = smov %s3924_s14 }
 0x1e4   : > { %s5043_s14 = smov %s4039_s30  ;;  %s5044_s15 = smov %s3936_s17 }
 0x1e5   : > { %s5045_s16 = smov %s3940_s18  ;;  %s5046_s17 = smov %s5049_s22 }
 0x1e6   : > { %s5047_s18 = smov %s5053_s23  ;;  %19 = sbr.rel (!%p17_p12) target bundleno = 7 (0x7), region = 90 }
 0x1ed   :  { %2873 = vsyncpa [#allocation3], 1 }
 0x1ee   :  { %2875 = vsyncpa [#allocation3 + $0x1], 1 }
 0x1ef   :  { %2876 = vsyncpa [#allocation5], 1 }
 0x1f0   :  { %2878 = vsyncpa [#allocation5 + $0x1], 1 }

</bundles_post_ra>
